<compile_context>
chip_gen: v7x
topology: tpu7x:2x2x1
jax: 0.10.0
libtpu: 0.0.40
codegen_flags: <defaults>
</compile_context>

<pallas_src>
import jax
import jax.numpy as jnp
from jax import lax
from jax.experimental import pallas as pl
from jax.experimental.pallas import tpu as pltpu

K = 7  # g_decode_kernel_size
_VMEM_LIMIT = 48 * 1024 * 1024  # fits v7x 64 MiB physical with headroom


def _round_up(x, m):
    return (x + m - 1) // m * m


# ----------------------------------------------------------------------------
# Fused decoder trunk: linear1 (split) + Shifted_conv stack, per batch element.
# ----------------------------------------------------------------------------
def _trunk_kernel(fm_ref, emb_ref, wf_ref, we_ref, b1_ref,
                  wv_ref, wg_ref, bv_ref, bg_ref, o_ref):
    # fm_ref:  (1, 1, E)   bf16  per-batch mean of encoder features
    # emb_ref: (1, T, emb) bf16  word embeddings
    # wf_ref:  (E, D) bf16 ; we_ref: (emb, D) bf16 ; b1_ref: (1, D) f32
    # wv_ref/wg_ref: (L, K, D, D) bf16  value / gate conv taps
    # bv_ref/bg_ref: (L, 1, D) f32
    # o_ref:   (1, T, D) f32
    T, D = o_ref.shape[1], o_ref.shape[2]
    L = wv_ref.shape[0]

    # linear1: feat-mean half broadcasts over T, embedding half is per step.
    hf = jnp.dot(fm_ref[0], wf_ref[...], preferred_element_type=jnp.float32)   # (1, D)
    x = (jnp.dot(emb_ref[0], we_ref[...], preferred_element_type=jnp.float32)
         + hf + b1_ref[...])                                                    # (T, D) f32

    row = lax.broadcasted_iota(jnp.int32, (T, D), 0)

    for l in range(L):                       # fused Shifted_conv stack
        xb = x.astype(jnp.bfloat16)
        val = jnp.zeros((T, D), jnp.float32)
        gate = jnp.zeros((T, D), jnp.float32)
        for k in range(K):
            # causal tap k: one ALIGNED matmul, then shift the OUTPUT down by
            # s = K-1-k rows (pltpu.roll on sublanes) and zero the first s rows.
            s = K - 1 - k
            zv = jnp.dot(xb, wv_ref[l, k], preferred_element_type=jnp.float32)  # (T, D)
            zg = jnp.dot(xb, wg_ref[l, k], preferred_element_type=jnp.float32)
            if s:
                zv = jnp.where(row >= s, pltpu.roll(zv, shift=s, axis=0), 0.0)
                zg = jnp.where(row >= s, pltpu.roll(zg, shift=s, axis=0), 0.0)
            val = val + zv
            gate = gate + zg
        val = val + bv_ref[l]
        gate = gate + bg_ref[l]
        x = val * jax.nn.sigmoid(gate) + x   # sig_gate (value * sig(gate)) + residual

    o_ref[0] = x.astype(o_ref.dtype)


def decoder_trunk(feat_mean, emb, w1_feat, w1_emb, b1, wv, wg, bv, bg):
    B, T, Demb = emb.shape
    E, D = w1_feat.shape
    L = wv.shape[0]
    return pl.pallas_call(
        _trunk_kernel,
        out_shape=jax.ShapeDtypeStruct((B, T, D), jnp.float32),
        grid=(B,),
        in_specs=[pl.BlockSpec((1, 1, E), lambda b: (b, 0, 0)),
                  pl.BlockSpec((1, T, Demb), lambda b: (b, 0, 0)),
                  pl.BlockSpec((E, D), lambda b: (0, 0)),
                  pl.BlockSpec((Demb, D), lambda b: (0, 0)),
                  pl.BlockSpec((1, D), lambda b: (0, 0)),
                  pl.BlockSpec((L, K, D, D), lambda b: (0, 0, 0, 0)),
                  pl.BlockSpec((L, K, D, D), lambda b: (0, 0, 0, 0)),
                  pl.BlockSpec((L, 1, D), lambda b: (0, 0, 0)),
                  pl.BlockSpec((L, 1, D), lambda b: (0, 0, 0))],
        out_specs=pl.BlockSpec((1, T, D), lambda b: (b, 0, 0)),
        compiler_params=pltpu.CompilerParams(
            dimension_semantics=("parallel",),
            vmem_limit_bytes=_VMEM_LIMIT),
    )(feat_mean.astype(jnp.bfloat16).reshape(B, 1, E),
      emb.astype(jnp.bfloat16),
      w1_feat.astype(jnp.bfloat16),
      w1_emb.astype(jnp.bfloat16),
      b1.astype(jnp.float32).reshape(1, D),
      wv.astype(jnp.bfloat16), wg.astype(jnp.bfloat16),
      bv.astype(jnp.float32), bg.astype(jnp.float32))


# ----------------------------------------------------------------------------
# Attention over all decode timesteps at once (w_prob already folded), per batch
# ----------------------------------------------------------------------------
def _attention_kernel(feat_ref, dec_ref, uenc_ref, udec_ref, bias_ref, o_ref):
    # feat_ref: (1, N, E)   bf16  raw encoder features
    # dec_ref:  (1, Tm1, D) bf16  trunk output
    # uenc_ref: (1, E) f32 = w_enc_att @ w_prob ; udec_ref: (1, D) f32
    # bias_ref: (1, 1) f32  folded biases
    # o_ref:    (1, Tm1, E) f32 attended context
    feat_bf = feat_ref[0]
    feat = feat_bf.astype(jnp.float32)
    dec = dec_ref[0].astype(jnp.float32)

    # tanh deliberately NOT applied (reproduces the `featrues` typo).
    # s_feat: (1, N) via "rhs-transposed" matmul; s_dec: (Tm1, 1) via VPU + lane reduce.
    s_feat = lax.dot_general(uenc_ref[...], feat, (((1,), (1,)), ((), ())),
                             preferred_element_type=jnp.float32)
    s_dec = jnp.sum(dec * udec_ref[...], axis=-1, keepdims=True)

    scores = s_dec + s_feat + bias_ref[0, 0]                       # (Tm1, N)
    scores = scores - jnp.max(scores, axis=-1, keepdims=True)
    e = jnp.exp(scores)
    p = e * pl.reciprocal(jnp.sum(e, axis=-1, keepdims=True), approx=True)

    o_ref[0] = jnp.dot(p.astype(jnp.bfloat16), feat_bf,
                       preferred_element_type=jnp.float32).astype(o_ref.dtype)


def attention_all(features, dec, u_enc, u_dec, att_bias):
    B, N, E = features.shape
    Tm1, D = dec.shape[1], dec.shape[2]
    return pl.pallas_call(
        _attention_kernel,
        out_shape=jax.ShapeDtypeStruct((B, Tm1, E), jnp.float32),
        grid=(B,),
        in_specs=[pl.BlockSpec((1, N, E), lambda b: (b, 0, 0)),
                  pl.BlockSpec((1, Tm1, D), lambda b: (b, 0, 0)),
                  pl.BlockSpec((1, E), lambda b: (0, 0)),
                  pl.BlockSpec((1, D), lambda b: (0, 0)),
                  pl.BlockSpec((1, 1), lambda b: (0, 0))],
        out_specs=pl.BlockSpec((1, Tm1, E), lambda b: (b, 0, 0)),
        compiler_params=pltpu.CompilerParams(
            dimension_semantics=("parallel",),
            vmem_limit_bytes=_VMEM_LIMIT),
    )(features.astype(jnp.bfloat16), dec.astype(jnp.bfloat16),
      u_enc.astype(jnp.float32), u_dec.astype(jnp.float32),
      att_bias.astype(jnp.float32))


# ----------------------------------------------------------------------------
# Tiled dual-input output projection: logits = ctx @ W2c + h @ W2h + b2
# (avoids materializing the [ctx, h] concat; tn is a multiple of 128)
# ----------------------------------------------------------------------------
def _dual_linear_kernel(a_ref, h_ref, wa_ref, wh_ref, b_ref, o_ref):
    acc = jnp.dot(a_ref[...], wa_ref[...], preferred_element_type=jnp.float32)
    acc = acc + jnp.dot(h_ref[...], wh_ref[...], preferred_element_type=jnp.float32)
    o_ref[...] = (acc + b_ref[...]).astype(o_ref.dtype)


def output_projection(a2d, h2d, wa, wh, b, *, tm_max=256, tn_max=512):
    M, Da = a2d.shape
    Dh = h2d.shape[1]
    V = wa.shape[1]
    tm = min(tm_max, _round_up(M, 8))
    tn = min(tn_max, _round_up(V, 128))
    Mp, Vp = _round_up(M, tm), _round_up(V, tn)
    ap = jnp.pad(a2d, ((0, Mp - M), (0, 0))).astype(jnp.bfloat16)
    hp = jnp.pad(h2d, ((0, Mp - M), (0, 0))).astype(jnp.bfloat16)
    wap = jnp.pad(wa, ((0, 0), (0, Vp - V))).astype(jnp.bfloat16)
    whp = jnp.pad(wh, ((0, 0), (0, Vp - V))).astype(jnp.bfloat16)
    bp = jnp.pad(b, (0, Vp - V)).astype(jnp.float32).reshape(1, Vp)
    out = pl.pallas_call(
        _dual_linear_kernel,
        # NOTE: logits kept f32; switch out dtype to bf16 if the loss tolerates it.
        out_shape=jax.ShapeDtypeStruct((Mp, Vp), jnp.float32),
        grid=(Mp // tm, Vp // tn),
        in_specs=[pl.BlockSpec((tm, Da), lambda i, j: (i, 0)),
                  pl.BlockSpec((tm, Dh), lambda i, j: (i, 0)),
                  pl.BlockSpec((Da, tn), lambda i, j: (0, j)),
                  pl.BlockSpec((Dh, tn), lambda i, j: (0, j)),
                  pl.BlockSpec((1, tn), lambda i, j: (0, j))],
        out_specs=pl.BlockSpec((tm, tn), lambda i, j: (i, j)),
        compiler_params=pltpu.CompilerParams(
            dimension_semantics=("parallel", "parallel"),
            vmem_limit_bytes=_VMEM_LIMIT),
    )(ap, hp, wap, whp, bp)
    return out[:M, :V]


# ----------------------------------------------------------------------------
# Full forward (matches TDconvD.forward)
# ----------------------------------------------------------------------------
def tdconvd_forward(params, features, captions, lengths=None):
    # `lengths` is accepted but unused, exactly like the PyTorch forward.
    del lengths
    if features.ndim == 2:
        features = features[:, None, :]
    B, N, E = features.shape
    T = captions.shape[1]
    D = params['w1'].shape[1]

    emb = jnp.take(params['embed'], captions, axis=0)              # (B, T, emb)
    feat_mean = jnp.mean(features, axis=1)                         # (B, E)

    # linear1 split: rows [0:E] act on the broadcast feat mean, rows [E:] on emb.
    w1_feat = params['w1'][:E]
    w1_emb = params['w1'][E:]

    # Conv weights: value/gate split, tap-indexed, stacked over layers.
    wv = jnp.stack([wc[:, :, :D] for wc, _ in params['convs']])    # (L, K, D, D)
    wg = jnp.stack([wc[:, :, D:] for wc, _ in params['convs']])    # (L, K, D, D)
    bv = jnp.stack([bc[:D].reshape(1, D) for _, bc in params['convs']])
    bg = jnp.stack([bc[D:].reshape(1, D) for _, bc in params['convs']])

    h = decoder_trunk(feat_mean, emb, w1_feat, w1_emb, params['b1'],
                      wv, wg, bv, bg)                              # (B, T, D)
    h = h[:, :-1, :]                                               # drop last step
    Tm1 = T - 1

    # Fold linear_prob into the attention projections (valid because the
    # reference's tanh result is discarded, so the score map is linear).
    wp = params['w_prob']                                          # (A, 1)
    u_enc = (params['w_enc_att'] @ wp).reshape(1, E)
    u_dec = (params['w_dec_att'] @ wp).reshape(1, D)
    att_bias = (params['b_enc_att'] @ wp + params['b_dec_att'] @ wp
                + params['b_prob']).reshape(1, 1)

    ctx = attention_all(features, h, u_enc, u_dec, att_bias)       # (B, Tm1, E)

    # linear2 split: rows [0:E] act on ctx, rows [E:] on h (cat order: ctx first).
    w2_ctx = params['w2'][:E]
    w2_h = params['w2'][E:]
    logits = output_projection(ctx.reshape(B * Tm1, E),
                               h.reshape(B * Tm1, D),
                               w2_ctx, w2_h, params['b2'])         # (B*Tm1, V)
    return logits.reshape(B, Tm1, -1)


# TODO(synk): beam-search `predict()` / `__predict()` (sequential, data-dependent
# Python control flow over beam_state objects) is not translated to Pallas.

if __name__ == "__main__":
    embed_size, decode_dim, encode_dim = 16, 32, 32
    attend_dim, vocab_size, layer = 16, 40, 2
    B, N, T = 2, 4, 8

    key = jax.random.PRNGKey(0)
    keys = jax.random.split(key, 20)

    def init(k, shape, scale=0.05):
        return scale * jax.random.normal(k, shape, dtype=jnp.float32)

    params = {
        'embed':     init(keys[0], (vocab_size, embed_size)),
        'w1':        init(keys[1], (encode_dim + embed_size, decode_dim)),
        'b1':        init(keys[2], (decode_dim,)),
        'w_enc_att': init(keys[3], (encode_dim, attend_dim)),
        'b_enc_att': init(keys[4], (attend_dim,)),
        'w_dec_att': init(keys[5], (decode_dim, attend_dim)),
        'b_dec_att': init(keys[6], (attend_dim,)),
        'w_prob':    init(keys[7], (attend_dim, 1)),
        'b_prob':    init(keys[8], (1,)),
        'w2':        init(keys[9], (encode_dim + decode_dim, vocab_size)),
        'b2':        init(keys[10], (vocab_size,)),
        'convs': [
            (init(keys[11], (K, decode_dim, 2 * decode_dim)),
             init(keys[12], (2 * decode_dim,))),
            (init(keys[13], (K, decode_dim, 2 * decode_dim)),
             init(keys[14], (2 * decode_dim,))),
        ][:layer],
    }

    features = init(keys[16], (B, N, encode_dim), scale=1.0)
    captions = jax.random.randint(keys[15], (B, T), 0, vocab_size)
    lengths = jnp.full((B,), T, dtype=jnp.int32)   # unused by forward

    fwd = jax.jit(tdconvd_forward)
    out = fwd(params, features, captions, lengths)
    out = jax.block_until_ready(out)
    assert out.shape == (B, T - 1, vocab_size), out.shape
    assert bool(jnp.all(jnp.isfinite(out)))
    print("KERNEL_OK")
</pallas_src>

<mosaic_0001>
module attributes {stable_mosaic.version = 11 : i64} {
  func.func @_attention_kernel(%arg0: i32, %arg1: memref<1x4x32xbf16, #tpu.memory_space<vmem>>, %arg2: memref<1x7x32xbf16, #tpu.memory_space<vmem>>, %arg3: memref<1x32xf32, #tpu.memory_space<vmem>>, %arg4: memref<1x32xf32, #tpu.memory_space<vmem>>, %arg5: memref<1x1xf32, #tpu.memory_space<vmem>>, %arg6: memref<1x7x32xf32, #tpu.memory_space<vmem>>) attributes {dimension_semantics = [#tpu.dimension_semantics<parallel>], iteration_bounds = array<i64: 2>, scalar_prefetch = 0 : i64, scratch_operands = 0 : i64, tpu.core_type = #tpu.core_type<tc>, window_params = [{transform_indices = @transform_0, window_bounds = array<i64: 1, 4, 32>}, {transform_indices = @transform_1, window_bounds = array<i64: 1, 7, 32>}, {pipeline_mode = #tpu.pipeline_mode<synchronous>, transform_indices = @transform_2, window_bounds = array<i64: 1, 32>}, {pipeline_mode = #tpu.pipeline_mode<synchronous>, transform_indices = @transform_3, window_bounds = array<i64: 1, 32>}, {pipeline_mode = #tpu.pipeline_mode<synchronous>, transform_indices = @transform_4, window_bounds = array<i64: 1, 1>}, {transform_indices = @transform_5, window_bounds = array<i64: 1, 7, 32>}]} {
    %c0 = arith.constant 0 : index
    %c0_0 = arith.constant 0 : index
    %c0_1 = arith.constant 0 : index
    %0 = vector.load %arg1[%c0, %c0_0, %c0_1] : memref<1x4x32xbf16, #tpu.memory_space<vmem>>, vector<1x4x32xbf16>
    %1 = vector.shape_cast %0 : vector<1x4x32xbf16> to vector<4x32xbf16>
    %2 = arith.extf %1 : vector<4x32xbf16> to vector<4x32xf32>
    %c0_2 = arith.constant 0 : index
    %c0_3 = arith.constant 0 : index
    %c0_4 = arith.constant 0 : index
    %3 = vector.load %arg2[%c0_2, %c0_3, %c0_4] : memref<1x7x32xbf16, #tpu.memory_space<vmem>>, vector<1x7x32xbf16>
    %4 = vector.shape_cast %3 : vector<1x7x32xbf16> to vector<7x32xbf16>
    %5 = arith.extf %4 : vector<7x32xbf16> to vector<7x32xf32>
    %c0_5 = arith.constant 0 : index
    %c0_6 = arith.constant 0 : index
    %6 = vector.load %arg3[%c0_5, %c0_6] : memref<1x32xf32, #tpu.memory_space<vmem>>, vector<1x32xf32>
    %cst = arith.constant dense<0.000000e+00> : vector<1x4xf32>
    %7 = tpu.matmul %6, %2, %cst {dimension_numbers = #tpu.dot_dimension_numbers<[1], [1], [0], [0], [0, 0, 1, 0], [], []>} : vector<1x32xf32>, vector<4x32xf32>, vector<1x4xf32> -> vector<1x4xf32>
    %c0_7 = arith.constant 0 : index
    %c0_8 = arith.constant 0 : index
    %8 = vector.load %arg4[%c0_7, %c0_8] : memref<1x32xf32, #tpu.memory_space<vmem>>, vector<1x32xf32>
    %9 = vector.broadcast %8 : vector<1x32xf32> to vector<7x32xf32>
    %10 = arith.mulf %5, %9 : vector<7x32xf32>
    %cst_9 = arith.constant dense<0.000000e+00> : vector<7xf32>
    %11 = vector.multi_reduction <add>, %10, %cst_9 [1] : vector<7x32xf32> to vector<7xf32>
    %12 = vector.shape_cast %11 : vector<7xf32> to vector<7x1xf32>
    %13 = vector.broadcast %12 : vector<7x1xf32> to vector<7x4xf32>
    %14 = vector.broadcast %7 : vector<1x4xf32> to vector<7x4xf32>
    %15 = arith.addf %13, %14 : vector<7x4xf32>
    %c0_10 = arith.constant 0 : index
    %c0_11 = arith.constant 0 : index
    %16 = vector.load %arg5[%c0_10, %c0_11] : memref<1x1xf32, #tpu.memory_space<vmem>>, vector<1x1xf32>
    %17 = vector.extract %16[0, 0] : f32 from vector<1x1xf32>
    %18 = vector.broadcast %17 : f32 to vector<7x4xf32>
    %19 = arith.addf %15, %18 : vector<7x4xf32>
    %cst_12 = arith.constant dense<0xFF800000> : vector<7xf32>
    %20 = vector.multi_reduction <maximumf>, %19, %cst_12 [1] : vector<7x4xf32> to vector<7xf32>
    %21 = vector.shape_cast %20 : vector<7xf32> to vector<7x1xf32>
    %22 = vector.broadcast %21 : vector<7x1xf32> to vector<7x4xf32>
    %23 = arith.subf %19, %22 : vector<7x4xf32>
    %24 = math.exp %23 : vector<7x4xf32>
    %cst_13 = arith.constant dense<0.000000e+00> : vector<7xf32>
    %25 = vector.multi_reduction <add>, %24, %cst_13 [1] : vector<7x4xf32> to vector<7xf32>
    %26 = vector.shape_cast %25 : vector<7xf32> to vector<7x1xf32>
    %27 = tpu.reciprocal %26 {approx = true} : vector<7x1xf32> -> vector<7x1xf32>
    %28 = vector.broadcast %27 : vector<7x1xf32> to vector<7x4xf32>
    %29 = arith.mulf %24, %28 : vector<7x4xf32>
    %30 = arith.truncf %29 : vector<7x4xf32> to vector<7x4xbf16>
    %cst_14 = arith.constant dense<0.000000e+00> : vector<7x32xf32>
    %31 = tpu.matmul %30, %1, %cst_14 {dimension_numbers = #tpu.dot_dimension_numbers<[1], [0], [0], [1], [0, 0, 1, 1], [], []>} : vector<7x4xbf16>, vector<4x32xbf16>, vector<7x32xf32> -> vector<7x32xf32>
    %c0_15 = arith.constant 0 : index
    %c0_16 = arith.constant 0 : index
    %c0_17 = arith.constant 0 : index
    %32 = vector.load %arg6[%c0_15, %c0_16, %c0_17] : memref<1x7x32xf32, #tpu.memory_space<vmem>>, vector<1x7x32xf32>
    %33 = vector.shape_cast %32 : vector<1x7x32xf32> to vector<7x32xf32>
    %34 = vector.shape_cast %31 : vector<7x32xf32> to vector<1x7x32xf32>
    tpu.vector_store %arg6[%c0_15, %c0_16, %c0_17], %34 {strides = array<i32>} : memref<1x7x32xf32, #tpu.memory_space<vmem>>, vector<1x7x32xf32>,
    return
  }
  func.func @transform_0(%arg0: i32) -> (i32, i32, i32) {
    %c0_i32 = arith.constant 0 : i32
    %c0_i32_0 = arith.constant 0 : i32
    %c0_i32_1 = arith.constant 0 : i32
    return %arg0, %c0_i32, %c0_i32_0 : i32, i32, i32
  }
  func.func @transform_1(%arg0: i32) -> (i32, i32, i32) {
    %c0_i32 = arith.constant 0 : i32
    %c0_i32_0 = arith.constant 0 : i32
    %c0_i32_1 = arith.constant 0 : i32
    return %arg0, %c0_i32, %c0_i32_0 : i32, i32, i32
  }
  func.func @transform_2(%arg0: i32) -> (i32, i32) {
    %c0_i32 = arith.constant 0 : i32
    %c0_i32_0 = arith.constant 0 : i32
    %c0_i32_1 = arith.constant 0 : i32
    return %c0_i32, %c0_i32_0 : i32, i32
  }
  func.func @transform_3(%arg0: i32) -> (i32, i32) {
    %c0_i32 = arith.constant 0 : i32
    %c0_i32_0 = arith.constant 0 : i32
    %c0_i32_1 = arith.constant 0 : i32
    return %c0_i32, %c0_i32_0 : i32, i32
  }
  func.func @transform_4(%arg0: i32) -> (i32, i32) {
    %c0_i32 = arith.constant 0 : i32
    %c0_i32_0 = arith.constant 0 : i32
    %c0_i32_1 = arith.constant 0 : i32
    return %c0_i32, %c0_i32_0 : i32, i32
  }
  func.func @transform_5(%arg0: i32) -> (i32, i32, i32) {
    %c0_i32 = arith.constant 0 : i32
    %c0_i32_0 = arith.constant 0 : i32
    %c0_i32_1 = arith.constant 0 : i32
    return %arg0, %c0_i32, %c0_i32_0 : i32, i32, i32
  }
}

module attributes {stable_mosaic.version = 11 : i64} {
  func.func @_trunk_kernel(%arg0: i32, %arg1: memref<1x1x32xbf16, #tpu.memory_space<vmem>>, %arg2: memref<1x8x16xbf16, #tpu.memory_space<vmem>>, %arg3: memref<32x32xbf16, #tpu.memory_space<vmem>>, %arg4: memref<16x32xbf16, #tpu.memory_space<vmem>>, %arg5: memref<1x32xf32, #tpu.memory_space<vmem>>, %arg6: memref<2x7x32x32xbf16, #tpu.memory_space<vmem>>, %arg7: memref<2x7x32x32xbf16, #tpu.memory_space<vmem>>, %arg8: memref<2x1x32xf32, #tpu.memory_space<vmem>>, %arg9: memref<2x1x32xf32, #tpu.memory_space<vmem>>, %arg10: memref<1x8x32xf32, #tpu.memory_space<vmem>>) attributes {dimension_semantics = [#tpu.dimension_semantics<parallel>], iteration_bounds = array<i64: 2>, scalar_prefetch = 0 : i64, scratch_operands = 0 : i64, tpu.core_type = #tpu.core_type<tc>, window_params = [{transform_indices = @transform_0, window_bounds = array<i64: 1, 1, 32>}, {transform_indices = @transform_1, window_bounds = array<i64: 1, 8, 16>}, {pipeline_mode = #tpu.pipeline_mode<synchronous>, transform_indices = @transform_2, window_bounds = array<i64: 32, 32>}, {pipeline_mode = #tpu.pipeline_mode<synchronous>, transform_indices = @transform_3, window_bounds = array<i64: 16, 32>}, {pipeline_mode = #tpu.pipeline_mode<synchronous>, transform_indices = @transform_4, window_bounds = array<i64: 1, 32>}, {pipeline_mode = #tpu.pipeline_mode<synchronous>, transform_indices = @transform_5, window_bounds = array<i64: 2, 7, 32, 32>}, {pipeline_mode = #tpu.pipeline_mode<synchronous>, transform_indices = @transform_6, window_bounds = array<i64: 2, 7, 32, 32>}, {pipeline_mode = #tpu.pipeline_mode<synchronous>, transform_indices = @transform_7, window_bounds = array<i64: 2, 1, 32>}, {pipeline_mode = #tpu.pipeline_mode<synchronous>, transform_indices = @transform_8, window_bounds = array<i64: 2, 1, 32>}, {transform_indices = @transform_9, window_bounds = array<i64: 1, 8, 32>}]} {
    %c0 = arith.constant 0 : index
    %c0_0 = arith.constant 0 : index
    %c0_1 = arith.constant 0 : index
    %0 = vector.load %arg1[%c0, %c0_0, %c0_1] : memref<1x1x32xbf16, #tpu.memory_space<vmem>>, vector<1x1x32xbf16>
    %1 = vector.shape_cast %0 : vector<1x1x32xbf16> to vector<1x32xbf16>
    %c0_2 = arith.constant 0 : index
    %c0_3 = arith.constant 0 : index
    %2 = vector.load %arg3[%c0_2, %c0_3] : memref<32x32xbf16, #tpu.memory_space<vmem>>, vector<32x32xbf16>
    %cst = arith.constant dense<0.000000e+00> : vector<1x32xf32>
    %3 = tpu.matmul %1, %2, %cst {dimension_numbers = #tpu.dot_dimension_numbers<[1], [0], [0], [1], [0, 0, 1, 1], [], []>} : vector<1x32xbf16>, vector<32x32xbf16>, vector<1x32xf32> -> vector<1x32xf32>
    %c0_4 = arith.constant 0 : index
    %c0_5 = arith.constant 0 : index
    %c0_6 = arith.constant 0 : index
    %4 = vector.load %arg2[%c0_4, %c0_5, %c0_6] : memref<1x8x16xbf16, #tpu.memory_space<vmem>>, vector<1x8x16xbf16>
    %5 = vector.shape_cast %4 : vector<1x8x16xbf16> to vector<8x16xbf16>
    %c0_7 = arith.constant 0 : index
    %c0_8 = arith.constant 0 : index
    %6 = vector.load %arg4[%c0_7, %c0_8] : memref<16x32xbf16, #tpu.memory_space<vmem>>, vector<16x32xbf16>
    %cst_9 = arith.constant dense<0.000000e+00> : vector<8x32xf32>
    %7 = tpu.matmul %5, %6, %cst_9 {dimension_numbers = #tpu.dot_dimension_numbers<[1], [0], [0], [1], [0, 0, 1, 1], [], []>} : vector<8x16xbf16>, vector<16x32xbf16>, vector<8x32xf32> -> vector<8x32xf32>
    %8 = vector.broadcast %3 : vector<1x32xf32> to vector<8x32xf32>
    %9 = arith.addf %7, %8 : vector<8x32xf32>
    %c0_10 = arith.constant 0 : index
    %c0_11 = arith.constant 0 : index
    %10 = vector.load %arg5[%c0_10, %c0_11] : memref<1x32xf32, #tpu.memory_space<vmem>>, vector<1x32xf32>
    %11 = vector.broadcast %10 : vector<1x32xf32> to vector<8x32xf32>
    %12 = arith.addf %9, %11 : vector<8x32xf32>
    %13 = tpu.iota {dimensions = array<i32: 0>} : vector<8x32xi32>
    %14 = arith.truncf %12 : vector<8x32xf32> to vector<8x32xbf16>
    %cst_12 = arith.constant 0.000000e+00 : f32
    %15 = vector.broadcast %cst_12 : f32 to vector<8x32xf32>
    %cst_13 = arith.constant 0.000000e+00 : f32
    %16 = vector.broadcast %cst_13 : f32 to vector<8x32xf32>
    %c0_14 = arith.constant 0 : index
    %c0_15 = arith.constant 0 : index
    %c0_16 = arith.constant 0 : index
    %c0_17 = arith.constant 0 : index
    %17 = vector.load %arg6[%c0_14, %c0_15, %c0_16, %c0_17] : memref<2x7x32x32xbf16, #tpu.memory_space<vmem>>, vector<1x1x32x32xbf16>
    %18 = vector.shape_cast %17 : vector<1x1x32x32xbf16> to vector<32x32xbf16>
    %cst_18 = arith.constant dense<0.000000e+00> : vector<8x32xf32>
    %19 = tpu.matmul %14, %18, %cst_18 {dimension_numbers = #tpu.dot_dimension_numbers<[1], [0], [0], [1], [0, 0, 1, 1], [], []>} : vector<8x32xbf16>, vector<32x32xbf16>, vector<8x32xf32> -> vector<8x32xf32>
    %c0_19 = arith.constant 0 : index
    %c0_20 = arith.constant 0 : index
    %c0_21 = arith.constant 0 : index
    %c0_22 = arith.constant 0 : index
    %20 = vector.load %arg7[%c0_19, %c0_20, %c0_21, %c0_22] : memref<2x7x32x32xbf16, #tpu.memory_space<vmem>>, vector<1x1x32x32xbf16>
    %21 = vector.shape_cast %20 : vector<1x1x32x32xbf16> to vector<32x32xbf16>
    %cst_23 = arith.constant dense<0.000000e+00> : vector<8x32xf32>
    %22 = tpu.matmul %14, %21, %cst_23 {dimension_numbers = #tpu.dot_dimension_numbers<[1], [0], [0], [1], [0, 0, 1, 1], [], []>} : vector<8x32xbf16>, vector<32x32xbf16>, vector<8x32xf32> -> vector<8x32xf32>
    %c6_i32 = arith.constant 6 : i32
    %23 = vector.broadcast %c6_i32 : i32 to vector<8x32xi32>
    %24 = arith.cmpi sge, %13, %23 : vector<8x32xi32>
    %c6_i32_24 = arith.constant 6 : i32
    %25 = tpu.dynamic_rotate %19 by %c6_i32_24 dim 0 : vector<8x32xf32>, i32 -> vector<8x32xf32>
    %cst_25 = arith.constant 0.000000e+00 : f32
    %26 = vector.broadcast %cst_25 : f32 to vector<8x32xf32>
    %27 = arith.select %24, %25, %26 : vector<8x32xi1>, vector<8x32xf32>
    %c6_i32_26 = arith.constant 6 : i32
    %28 = vector.broadcast %c6_i32_26 : i32 to vector<8x32xi32>
    %29 = arith.cmpi sge, %13, %28 : vector<8x32xi32>
    %c6_i32_27 = arith.constant 6 : i32
    %30 = tpu.dynamic_rotate %22 by %c6_i32_27 dim 0 : vector<8x32xf32>, i32 -> vector<8x32xf32>
    %cst_28 = arith.constant 0.000000e+00 : f32
    %31 = vector.broadcast %cst_28 : f32 to vector<8x32xf32>
    %32 = arith.select %29, %30, %31 : vector<8x32xi1>, vector<8x32xf32>
    %33 = arith.addf %15, %27 : vector<8x32xf32>
    %34 = arith.addf %16, %32 : vector<8x32xf32>
    %c0_29 = arith.constant 0 : index
    %c1 = arith.constant 1 : index
    %c0_30 = arith.constant 0 : index
    %c0_31 = arith.constant 0 : index
    %35 = vector.load %arg6[%c0_29, %c1, %c0_30, %c0_31] : memref<2x7x32x32xbf16, #tpu.memory_space<vmem>>, vector<1x1x32x32xbf16>
    %36 = vector.shape_cast %35 : vector<1x1x32x32xbf16> to vector<32x32xbf16>
    %cst_32 = arith.constant dense<0.000000e+00> : vector<8x32xf32>
    %37 = tpu.matmul %14, %36, %cst_32 {dimension_numbers = #tpu.dot_dimension_numbers<[1], [0], [0], [1], [0, 0, 1, 1], [], []>} : vector<8x32xbf16>, vector<32x32xbf16>, vector<8x32xf32> -> vector<8x32xf32>
    %c0_33 = arith.constant 0 : index
    %c1_34 = arith.constant 1 : index
    %c0_35 = arith.constant 0 : index
    %c0_36 = arith.constant 0 : index
    %38 = vector.load %arg7[%c0_33, %c1_34, %c0_35, %c0_36] : memref<2x7x32x32xbf16, #tpu.memory_space<vmem>>, vector<1x1x32x32xbf16>
    %39 = vector.shape_cast %38 : vector<1x1x32x32xbf16> to vector<32x32xbf16>
    %cst_37 = arith.constant dense<0.000000e+00> : vector<8x32xf32>
    %40 = tpu.matmul %14, %39, %cst_37 {dimension_numbers = #tpu.dot_dimension_numbers<[1], [0], [0], [1], [0, 0, 1, 1], [], []>} : vector<8x32xbf16>, vector<32x32xbf16>, vector<8x32xf32> -> vector<8x32xf32>
    %c5_i32 = arith.constant 5 : i32
    %41 = vector.broadcast %c5_i32 : i32 to vector<8x32xi32>
    %42 = arith.cmpi sge, %13, %41 : vector<8x32xi32>
    %c5_i32_38 = arith.constant 5 : i32
    %43 = tpu.dynamic_rotate %37 by %c5_i32_38 dim 0 : vector<8x32xf32>, i32 -> vector<8x32xf32>
    %cst_39 = arith.constant 0.000000e+00 : f32
    %44 = vector.broadcast %cst_39 : f32 to vector<8x32xf32>
    %45 = arith.select %42, %43, %44 : vector<8x32xi1>, vector<8x32xf32>
    %c5_i32_40 = arith.constant 5 : i32
    %46 = vector.broadcast %c5_i32_40 : i32 to vector<8x32xi32>
    %47 = arith.cmpi sge, %13, %46 : vector<8x32xi32>
    %c5_i32_41 = arith.constant 5 : i32
    %48 = tpu.dynamic_rotate %40 by %c5_i32_41 dim 0 : vector<8x32xf32>, i32 -> vector<8x32xf32>
    %cst_42 = arith.constant 0.000000e+00 : f32
    %49 = vector.broadcast %cst_42 : f32 to vector<8x32xf32>
    %50 = arith.select %47, %48, %49 : vector<8x32xi1>, vector<8x32xf32>
    %51 = arith.addf %33, %45 : vector<8x32xf32>
    %52 = arith.addf %34, %50 : vector<8x32xf32>
    %c0_43 = arith.constant 0 : index
    %c2 = arith.constant 2 : index
    %c0_44 = arith.constant 0 : index
    %c0_45 = arith.constant 0 : index
    %53 = vector.load %arg6[%c0_43, %c2, %c0_44, %c0_45] : memref<2x7x32x32xbf16, #tpu.memory_space<vmem>>, vector<1x1x32x32xbf16>
    %54 = vector.shape_cast %53 : vector<1x1x32x32xbf16> to vector<32x32xbf16>
    %cst_46 = arith.constant dense<0.000000e+00> : vector<8x32xf32>
    %55 = tpu.matmul %14, %54, %cst_46 {dimension_numbers = #tpu.dot_dimension_numbers<[1], [0], [0], [1], [0, 0, 1, 1], [], []>} : vector<8x32xbf16>, vector<32x32xbf16>, vector<8x32xf32> -> vector<8x32xf32>
    %c0_47 = arith.constant 0 : index
    %c2_48 = arith.constant 2 : index
    %c0_49 = arith.constant 0 : index
    %c0_50 = arith.constant 0 : index
    %56 = vector.load %arg7[%c0_47, %c2_48, %c0_49, %c0_50] : memref<2x7x32x32xbf16, #tpu.memory_space<vmem>>, vector<1x1x32x32xbf16>
    %57 = vector.shape_cast %56 : vector<1x1x32x32xbf16> to vector<32x32xbf16>
    %cst_51 = arith.constant dense<0.000000e+00> : vector<8x32xf32>
    %58 = tpu.matmul %14, %57, %cst_51 {dimension_numbers = #tpu.dot_dimension_numbers<[1], [0], [0], [1], [0, 0, 1, 1], [], []>} : vector<8x32xbf16>, vector<32x32xbf16>, vector<8x32xf32> -> vector<8x32xf32>
    %c4_i32 = arith.constant 4 : i32
    %59 = vector.broadcast %c4_i32 : i32 to vector<8x32xi32>
    %60 = arith.cmpi sge, %13, %59 : vector<8x32xi32>
    %c4_i32_52 = arith.constant 4 : i32
    %61 = tpu.dynamic_rotate %55 by %c4_i32_52 dim 0 : vector<8x32xf32>, i32 -> vector<8x32xf32>
    %cst_53 = arith.constant 0.000000e+00 : f32
    %62 = vector.broadcast %cst_53 : f32 to vector<8x32xf32>
    %63 = arith.select %60, %61, %62 : vector<8x32xi1>, vector<8x32xf32>
    %c4_i32_54 = arith.constant 4 : i32
    %64 = vector.broadcast %c4_i32_54 : i32 to vector<8x32xi32>
    %65 = arith.cmpi sge, %13, %64 : vector<8x32xi32>
    %c4_i32_55 = arith.constant 4 : i32
    %66 = tpu.dynamic_rotate %58 by %c4_i32_55 dim 0 : vector<8x32xf32>, i32 -> vector<8x32xf32>
    %cst_56 = arith.constant 0.000000e+00 : f32
    %67 = vector.broadcast %cst_56 : f32 to vector<8x32xf32>
    %68 = arith.select %65, %66, %67 : vector<8x32xi1>, vector<8x32xf32>
    %69 = arith.addf %51, %63 : vector<8x32xf32>
    %70 = arith.addf %52, %68 : vector<8x32xf32>
    %c0_57 = arith.constant 0 : index
    %c3 = arith.constant 3 : index
    %c0_58 = arith.constant 0 : index
    %c0_59 = arith.constant 0 : index
    %71 = vector.load %arg6[%c0_57, %c3, %c0_58, %c0_59] : memref<2x7x32x32xbf16, #tpu.memory_space<vmem>>, vector<1x1x32x32xbf16>
    %72 = vector.shape_cast %71 : vector<1x1x32x32xbf16> to vector<32x32xbf16>
    %cst_60 = arith.constant dense<0.000000e+00> : vector<8x32xf32>
    %73 = tpu.matmul %14, %72, %cst_60 {dimension_numbers = #tpu.dot_dimension_numbers<[1], [0], [0], [1], [0, 0, 1, 1], [], []>} : vector<8x32xbf16>, vector<32x32xbf16>, vector<8x32xf32> -> vector<8x32xf32>
    %c0_61 = arith.constant 0 : index
    %c3_62 = arith.constant 3 : index
    %c0_63 = arith.constant 0 : index
    %c0_64 = arith.constant 0 : index
    %74 = vector.load %arg7[%c0_61, %c3_62, %c0_63, %c0_64] : memref<2x7x32x32xbf16, #tpu.memory_space<vmem>>, vector<1x1x32x32xbf16>
    %75 = vector.shape_cast %74 : vector<1x1x32x32xbf16> to vector<32x32xbf16>
    %cst_65 = arith.constant dense<0.000000e+00> : vector<8x32xf32>
    %76 = tpu.matmul %14, %75, %cst_65 {dimension_numbers = #tpu.dot_dimension_numbers<[1], [0], [0], [1], [0, 0, 1, 1], [], []>} : vector<8x32xbf16>, vector<32x32xbf16>, vector<8x32xf32> -> vector<8x32xf32>
    %c3_i32 = arith.constant 3 : i32
    %77 = vector.broadcast %c3_i32 : i32 to vector<8x32xi32>
    %78 = arith.cmpi sge, %13, %77 : vector<8x32xi32>
    %c3_i32_66 = arith.constant 3 : i32
    %79 = tpu.dynamic_rotate %73 by %c3_i32_66 dim 0 : vector<8x32xf32>, i32 -> vector<8x32xf32>
    %cst_67 = arith.constant 0.000000e+00 : f32
    %80 = vector.broadcast %cst_67 : f32 to vector<8x32xf32>
    %81 = arith.select %78, %79, %80 : vector<8x32xi1>, vector<8x32xf32>
    %c3_i32_68 = arith.constant 3 : i32
    %82 = vector.broadcast %c3_i32_68 : i32 to vector<8x32xi32>
    %83 = arith.cmpi sge, %13, %82 : vector<8x32xi32>
    %c3_i32_69 = arith.constant 3 : i32
    %84 = tpu.dynamic_rotate %76 by %c3_i32_69 dim 0 : vector<8x32xf32>, i32 -> vector<8x32xf32>
    %cst_70 = arith.constant 0.000000e+00 : f32
    %85 = vector.broadcast %cst_70 : f32 to vector<8x32xf32>
    %86 = arith.select %83, %84, %85 : vector<8x32xi1>, vector<8x32xf32>
    %87 = arith.addf %69, %81 : vector<8x32xf32>
    %88 = arith.addf %70, %86 : vector<8x32xf32>
    %c0_71 = arith.constant 0 : index
    %c4 = arith.constant 4 : index
    %c0_72 = arith.constant 0 : index
    %c0_73 = arith.constant 0 : index
    %89 = vector.load %arg6[%c0_71, %c4, %c0_72, %c0_73] : memref<2x7x32x32xbf16, #tpu.memory_space<vmem>>, vector<1x1x32x32xbf16>
    %90 = vector.shape_cast %89 : vector<1x1x32x32xbf16> to vector<32x32xbf16>
    %cst_74 = arith.constant dense<0.000000e+00> : vector<8x32xf32>
    %91 = tpu.matmul %14, %90, %cst_74 {dimension_numbers = #tpu.dot_dimension_numbers<[1], [0], [0], [1], [0, 0, 1, 1], [], []>} : vector<8x32xbf16>, vector<32x32xbf16>, vector<8x32xf32> -> vector<8x32xf32>
    %c0_75 = arith.constant 0 : index
    %c4_76 = arith.constant 4 : index
    %c0_77 = arith.constant 0 : index
    %c0_78 = arith.constant 0 : index
    %92 = vector.load %arg7[%c0_75, %c4_76, %c0_77, %c0_78] : memref<2x7x32x32xbf16, #tpu.memory_space<vmem>>, vector<1x1x32x32xbf16>
    %93 = vector.shape_cast %92 : vector<1x1x32x32xbf16> to vector<32x32xbf16>
    %cst_79 = arith.constant dense<0.000000e+00> : vector<8x32xf32>
    %94 = tpu.matmul %14, %93, %cst_79 {dimension_numbers = #tpu.dot_dimension_numbers<[1], [0], [0], [1], [0, 0, 1, 1], [], []>} : vector<8x32xbf16>, vector<32x32xbf16>, vector<8x32xf32> -> vector<8x32xf32>
    %c2_i32 = arith.constant 2 : i32
    %95 = vector.broadcast %c2_i32 : i32 to vector<8x32xi32>
    %96 = arith.cmpi sge, %13, %95 : vector<8x32xi32>
    %c2_i32_80 = arith.constant 2 : i32
    %97 = tpu.dynamic_rotate %91 by %c2_i32_80 dim 0 : vector<8x32xf32>, i32 -> vector<8x32xf32>
    %cst_81 = arith.constant 0.000000e+00 : f32
    %98 = vector.broadcast %cst_81 : f32 to vector<8x32xf32>
    %99 = arith.select %96, %97, %98 : vector<8x32xi1>, vector<8x32xf32>
    %c2_i32_82 = arith.constant 2 : i32
    %100 = vector.broadcast %c2_i32_82 : i32 to vector<8x32xi32>
    %101 = arith.cmpi sge, %13, %100 : vector<8x32xi32>
    %c2_i32_83 = arith.constant 2 : i32
    %102 = tpu.dynamic_rotate %94 by %c2_i32_83 dim 0 : vector<8x32xf32>, i32 -> vector<8x32xf32>
    %cst_84 = arith.constant 0.000000e+00 : f32
    %103 = vector.broadcast %cst_84 : f32 to vector<8x32xf32>
    %104 = arith.select %101, %102, %103 : vector<8x32xi1>, vector<8x32xf32>
    %105 = arith.addf %87, %99 : vector<8x32xf32>
    %106 = arith.addf %88, %104 : vector<8x32xf32>
    %c0_85 = arith.constant 0 : index
    %c5 = arith.constant 5 : index
    %c0_86 = arith.constant 0 : index
    %c0_87 = arith.constant 0 : index
    %107 = vector.load %arg6[%c0_85, %c5, %c0_86, %c0_87] : memref<2x7x32x32xbf16, #tpu.memory_space<vmem>>, vector<1x1x32x32xbf16>
    %108 = vector.shape_cast %107 : vector<1x1x32x32xbf16> to vector<32x32xbf16>
    %cst_88 = arith.constant dense<0.000000e+00> : vector<8x32xf32>
    %109 = tpu.matmul %14, %108, %cst_88 {dimension_numbers = #tpu.dot_dimension_numbers<[1], [0], [0], [1], [0, 0, 1, 1], [], []>} : vector<8x32xbf16>, vector<32x32xbf16>, vector<8x32xf32> -> vector<8x32xf32>
    %c0_89 = arith.constant 0 : index
    %c5_90 = arith.constant 5 : index
    %c0_91 = arith.constant 0 : index
    %c0_92 = arith.constant 0 : index
    %110 = vector.load %arg7[%c0_89, %c5_90, %c0_91, %c0_92] : memref<2x7x32x32xbf16, #tpu.memory_space<vmem>>, vector<1x1x32x32xbf16>
    %111 = vector.shape_cast %110 : vector<1x1x32x32xbf16> to vector<32x32xbf16>
    %cst_93 = arith.constant dense<0.000000e+00> : vector<8x32xf32>
    %112 = tpu.matmul %14, %111, %cst_93 {dimension_numbers = #tpu.dot_dimension_numbers<[1], [0], [0], [1], [0, 0, 1, 1], [], []>} : vector<8x32xbf16>, vector<32x32xbf16>, vector<8x32xf32> -> vector<8x32xf32>
    %c1_i32 = arith.constant 1 : i32
    %113 = vector.broadcast %c1_i32 : i32 to vector<8x32xi32>
    %114 = arith.cmpi sge, %13, %113 : vector<8x32xi32>
    %c1_i32_94 = arith.constant 1 : i32
    %115 = tpu.dynamic_rotate %109 by %c1_i32_94 dim 0 : vector<8x32xf32>, i32 -> vector<8x32xf32>
    %cst_95 = arith.constant 0.000000e+00 : f32
    %116 = vector.broadcast %cst_95 : f32 to vector<8x32xf32>
    %117 = arith.select %114, %115, %116 : vector<8x32xi1>, vector<8x32xf32>
    %c1_i32_96 = arith.constant 1 : i32
    %118 = vector.broadcast %c1_i32_96 : i32 to vector<8x32xi32>
    %119 = arith.cmpi sge, %13, %118 : vector<8x32xi32>
    %c1_i32_97 = arith.constant 1 : i32
    %120 = tpu.dynamic_rotate %112 by %c1_i32_97 dim 0 : vector<8x32xf32>, i32 -> vector<8x32xf32>
    %cst_98 = arith.constant 0.000000e+00 : f32
    %121 = vector.broadcast %cst_98 : f32 to vector<8x32xf32>
    %122 = arith.select %119, %120, %121 : vector<8x32xi1>, vector<8x32xf32>
    %123 = arith.addf %105, %117 : vector<8x32xf32>
    %124 = arith.addf %106, %122 : vector<8x32xf32>
    %c0_99 = arith.constant 0 : index
    %c6 = arith.constant 6 : index
    %c0_100 = arith.constant 0 : index
    %c0_101 = arith.constant 0 : index
    %125 = vector.load %arg6[%c0_99, %c6, %c0_100, %c0_101] : memref<2x7x32x32xbf16, #tpu.memory_space<vmem>>, vector<1x1x32x32xbf16>
    %126 = vector.shape_cast %125 : vector<1x1x32x32xbf16> to vector<32x32xbf16>
    %cst_102 = arith.constant dense<0.000000e+00> : vector<8x32xf32>
    %127 = tpu.matmul %14, %126, %cst_102 {dimension_numbers = #tpu.dot_dimension_numbers<[1], [0], [0], [1], [0, 0, 1, 1], [], []>} : vector<8x32xbf16>, vector<32x32xbf16>, vector<8x32xf32> -> vector<8x32xf32>
    %c0_103 = arith.constant 0 : index
    %c6_104 = arith.constant 6 : index
    %c0_105 = arith.constant 0 : index
    %c0_106 = arith.constant 0 : index
    %128 = vector.load %arg7[%c0_103, %c6_104, %c0_105, %c0_106] : memref<2x7x32x32xbf16, #tpu.memory_space<vmem>>, vector<1x1x32x32xbf16>
    %129 = vector.shape_cast %128 : vector<1x1x32x32xbf16> to vector<32x32xbf16>
    %cst_107 = arith.constant dense<0.000000e+00> : vector<8x32xf32>
    %130 = tpu.matmul %14, %129, %cst_107 {dimension_numbers = #tpu.dot_dimension_numbers<[1], [0], [0], [1], [0, 0, 1, 1], [], []>} : vector<8x32xbf16>, vector<32x32xbf16>, vector<8x32xf32> -> vector<8x32xf32>
    %131 = arith.addf %123, %127 : vector<8x32xf32>
    %132 = arith.addf %124, %130 : vector<8x32xf32>
    %c0_108 = arith.constant 0 : index
    %c0_109 = arith.constant 0 : index
    %c0_110 = arith.constant 0 : index
    %133 = vector.load %arg8[%c0_108, %c0_109, %c0_110] : memref<2x1x32xf32, #tpu.memory_space<vmem>>, vector<1x1x32xf32>
    %134 = vector.shape_cast %133 : vector<1x1x32xf32> to vector<1x32xf32>
    %135 = vector.broadcast %134 : vector<1x32xf32> to vector<8x32xf32>
    %136 = arith.addf %131, %135 : vector<8x32xf32>
    %c0_111 = arith.constant 0 : index
    %c0_112 = arith.constant 0 : index
    %c0_113 = arith.constant 0 : index
    %137 = vector.load %arg9[%c0_111, %c0_112, %c0_113] : memref<2x1x32xf32, #tpu.memory_space<vmem>>, vector<1x1x32xf32>
    %138 = vector.shape_cast %137 : vector<1x1x32xf32> to vector<1x32xf32>
    %139 = vector.broadcast %138 : vector<1x32xf32> to vector<8x32xf32>
    %140 = arith.addf %132, %139 : vector<8x32xf32>
    %141 = arith.negf %140 : vector<8x32xf32>
    %142 = math.exp %141 : vector<8x32xf32>
    %cst_114 = arith.constant 1.000000e+00 : f32
    %143 = vector.broadcast %cst_114 : f32 to vector<8x32xf32>
    %144 = arith.addf %143, %142 : vector<8x32xf32>
    %145 = arith.divf %143, %144 : vector<8x32xf32>
    %146 = arith.mulf %136, %145 : vector<8x32xf32>
    %147 = arith.addf %146, %12 : vector<8x32xf32>
    %148 = arith.truncf %147 : vector<8x32xf32> to vector<8x32xbf16>
    %cst_115 = arith.constant 0.000000e+00 : f32
    %149 = vector.broadcast %cst_115 : f32 to vector<8x32xf32>
    %cst_116 = arith.constant 0.000000e+00 : f32
    %150 = vector.broadcast %cst_116 : f32 to vector<8x32xf32>
    %c1_117 = arith.constant 1 : index
    %c0_118 = arith.constant 0 : index
    %c0_119 = arith.constant 0 : index
    %c0_120 = arith.constant 0 : index
    %151 = vector.load %arg6[%c1_117, %c0_118, %c0_119, %c0_120] : memref<2x7x32x32xbf16, #tpu.memory_space<vmem>>, vector<1x1x32x32xbf16>
    %152 = vector.shape_cast %151 : vector<1x1x32x32xbf16> to vector<32x32xbf16>
    %cst_121 = arith.constant dense<0.000000e+00> : vector<8x32xf32>
    %153 = tpu.matmul %148, %152, %cst_121 {dimension_numbers = #tpu.dot_dimension_numbers<[1], [0], [0], [1], [0, 0, 1, 1], [], []>} : vector<8x32xbf16>, vector<32x32xbf16>, vector<8x32xf32> -> vector<8x32xf32>
    %c1_122 = arith.constant 1 : index
    %c0_123 = arith.constant 0 : index
    %c0_124 = arith.constant 0 : index
    %c0_125 = arith.constant 0 : index
    %154 = vector.load %arg7[%c1_122, %c0_123, %c0_124, %c0_125] : memref<2x7x32x32xbf16, #tpu.memory_space<vmem>>, vector<1x1x32x32xbf16>
    %155 = vector.shape_cast %154 : vector<1x1x32x32xbf16> to vector<32x32xbf16>
    %cst_126 = arith.constant dense<0.000000e+00> : vector<8x32xf32>
    %156 = tpu.matmul %148, %155, %cst_126 {dimension_numbers = #tpu.dot_dimension_numbers<[1], [0], [0], [1], [0, 0, 1, 1], [], []>} : vector<8x32xbf16>, vector<32x32xbf16>, vector<8x32xf32> -> vector<8x32xf32>
    %c6_i32_127 = arith.constant 6 : i32
    %157 = vector.broadcast %c6_i32_127 : i32 to vector<8x32xi32>
    %158 = arith.cmpi sge, %13, %157 : vector<8x32xi32>
    %c6_i32_128 = arith.constant 6 : i32
    %159 = tpu.dynamic_rotate %153 by %c6_i32_128 dim 0 : vector<8x32xf32>, i32 -> vector<8x32xf32>
    %cst_129 = arith.constant 0.000000e+00 : f32
    %160 = vector.broadcast %cst_129 : f32 to vector<8x32xf32>
    %161 = arith.select %158, %159, %160 : vector<8x32xi1>, vector<8x32xf32>
    %c6_i32_130 = arith.constant 6 : i32
    %162 = vector.broadcast %c6_i32_130 : i32 to vector<8x32xi32>
    %163 = arith.cmpi sge, %13, %162 : vector<8x32xi32>
    %c6_i32_131 = arith.constant 6 : i32
    %164 = tpu.dynamic_rotate %156 by %c6_i32_131 dim 0 : vector<8x32xf32>, i32 -> vector<8x32xf32>
    %cst_132 = arith.constant 0.000000e+00 : f32
    %165 = vector.broadcast %cst_132 : f32 to vector<8x32xf32>
    %166 = arith.select %163, %164, %165 : vector<8x32xi1>, vector<8x32xf32>
    %167 = arith.addf %149, %161 : vector<8x32xf32>
    %168 = arith.addf %150, %166 : vector<8x32xf32>
    %c1_133 = arith.constant 1 : index
    %c1_134 = arith.constant 1 : index
    %c0_135 = arith.constant 0 : index
    %c0_136 = arith.constant 0 : index
    %169 = vector.load %arg6[%c1_133, %c1_134, %c0_135, %c0_136] : memref<2x7x32x32xbf16, #tpu.memory_space<vmem>>, vector<1x1x32x32xbf16>
    %170 = vector.shape_cast %169 : vector<1x1x32x32xbf16> to vector<32x32xbf16>
    %cst_137 = arith.constant dense<0.000000e+00> : vector<8x32xf32>
    %171 = tpu.matmul %148, %170, %cst_137 {dimension_numbers = #tpu.dot_dimension_numbers<[1], [0], [0], [1], [0, 0, 1, 1], [], []>} : vector<8x32xbf16>, vector<32x32xbf16>, vector<8x32xf32> -> vector<8x32xf32>
    %c1_138 = arith.constant 1 : index
    %c1_139 = arith.constant 1 : index
    %c0_140 = arith.constant 0 : index
    %c0_141 = arith.constant 0 : index
    %172 = vector.load %arg7[%c1_138, %c1_139, %c0_140, %c0_141] : memref<2x7x32x32xbf16, #tpu.memory_space<vmem>>, vector<1x1x32x32xbf16>
    %173 = vector.shape_cast %172 : vector<1x1x32x32xbf16> to vector<32x32xbf16>
    %cst_142 = arith.constant dense<0.000000e+00> : vector<8x32xf32>
    %174 = tpu.matmul %148, %173, %cst_142 {dimension_numbers = #tpu.dot_dimension_numbers<[1], [0], [0], [1], [0, 0, 1, 1], [], []>} : vector<8x32xbf16>, vector<32x32xbf16>, vector<8x32xf32> -> vector<8x32xf32>
    %c5_i32_143 = arith.constant 5 : i32
    %175 = vector.broadcast %c5_i32_143 : i32 to vector<8x32xi32>
    %176 = arith.cmpi sge, %13, %175 : vector<8x32xi32>
    %c5_i32_144 = arith.constant 5 : i32
    %177 = tpu.dynamic_rotate %171 by %c5_i32_144 dim 0 : vector<8x32xf32>, i32 -> vector<8x32xf32>
    %cst_145 = arith.constant 0.000000e+00 : f32
    %178 = vector.broadcast %cst_145 : f32 to vector<8x32xf32>
    %179 = arith.select %176, %177, %178 : vector<8x32xi1>, vector<8x32xf32>
    %c5_i32_146 = arith.constant 5 : i32
    %180 = vector.broadcast %c5_i32_146 : i32 to vector<8x32xi32>
    %181 = arith.cmpi sge, %13, %180 : vector<8x32xi32>
    %c5_i32_147 = arith.constant 5 : i32
    %182 = tpu.dynamic_rotate %174 by %c5_i32_147 dim 0 : vector<8x32xf32>, i32 -> vector<8x32xf32>
    %cst_148 = arith.constant 0.000000e+00 : f32
    %183 = vector.broadcast %cst_148 : f32 to vector<8x32xf32>
    %184 = arith.select %181, %182, %183 : vector<8x32xi1>, vector<8x32xf32>
    %185 = arith.addf %167, %179 : vector<8x32xf32>
    %186 = arith.addf %168, %184 : vector<8x32xf32>
    %c1_149 = arith.constant 1 : index
    %c2_150 = arith.constant 2 : index
    %c0_151 = arith.constant 0 : index
    %c0_152 = arith.constant 0 : index
    %187 = vector.load %arg6[%c1_149, %c2_150, %c0_151, %c0_152] : memref<2x7x32x32xbf16, #tpu.memory_space<vmem>>, vector<1x1x32x32xbf16>
    %188 = vector.shape_cast %187 : vector<1x1x32x32xbf16> to vector<32x32xbf16>
    %cst_153 = arith.constant dense<0.000000e+00> : vector<8x32xf32>
    %189 = tpu.matmul %148, %188, %cst_153 {dimension_numbers = #tpu.dot_dimension_numbers<[1], [0], [0], [1], [0, 0, 1, 1], [], []>} : vector<8x32xbf16>, vector<32x32xbf16>, vector<8x32xf32> -> vector<8x32xf32>
    %c1_154 = arith.constant 1 : index
    %c2_155 = arith.constant 2 : index
    %c0_156 = arith.constant 0 : index
    %c0_157 = arith.constant 0 : index
    %190 = vector.load %arg7[%c1_154, %c2_155, %c0_156, %c0_157] : memref<2x7x32x32xbf16, #tpu.memory_space<vmem>>, vector<1x1x32x32xbf16>
    %191 = vector.shape_cast %190 : vector<1x1x32x32xbf16> to vector<32x32xbf16>
    %cst_158 = arith.constant dense<0.000000e+00> : vector<8x32xf32>
    %192 = tpu.matmul %148, %191, %cst_158 {dimension_numbers = #tpu.dot_dimension_numbers<[1], [0], [0], [1], [0, 0, 1, 1], [], []>} : vector<8x32xbf16>, vector<32x32xbf16>, vector<8x32xf32> -> vector<8x32xf32>
    %c4_i32_159 = arith.constant 4 : i32
    %193 = vector.broadcast %c4_i32_159 : i32 to vector<8x32xi32>
    %194 = arith.cmpi sge, %13, %193 : vector<8x32xi32>
    %c4_i32_160 = arith.constant 4 : i32
    %195 = tpu.dynamic_rotate %189 by %c4_i32_160 dim 0 : vector<8x32xf32>, i32 -> vector<8x32xf32>
    %cst_161 = arith.constant 0.000000e+00 : f32
    %196 = vector.broadcast %cst_161 : f32 to vector<8x32xf32>
    %197 = arith.select %194, %195, %196 : vector<8x32xi1>, vector<8x32xf32>
    %c4_i32_162 = arith.constant 4 : i32
    %198 = vector.broadcast %c4_i32_162 : i32 to vector<8x32xi32>
    %199 = arith.cmpi sge, %13, %198 : vector<8x32xi32>
    %c4_i32_163 = arith.constant 4 : i32
    %200 = tpu.dynamic_rotate %192 by %c4_i32_163 dim 0 : vector<8x32xf32>, i32 -> vector<8x32xf32>
    %cst_164 = arith.constant 0.000000e+00 : f32
    %201 = vector.broadcast %cst_164 : f32 to vector<8x32xf32>
    %202 = arith.select %199, %200, %201 : vector<8x32xi1>, vector<8x32xf32>
    %203 = arith.addf %185, %197 : vector<8x32xf32>
    %204 = arith.addf %186, %202 : vector<8x32xf32>
    %c1_165 = arith.constant 1 : index
    %c3_166 = arith.constant 3 : index
    %c0_167 = arith.constant 0 : index
    %c0_168 = arith.constant 0 : index
    %205 = vector.load %arg6[%c1_165, %c3_166, %c0_167, %c0_168] : memref<2x7x32x32xbf16, #tpu.memory_space<vmem>>, vector<1x1x32x32xbf16>
    %206 = vector.shape_cast %205 : vector<1x1x32x32xbf16> to vector<32x32xbf16>
    %cst_169 = arith.constant dense<0.000000e+00> : vector<8x32xf32>
    %207 = tpu.matmul %148, %206, %cst_169 {dimension_numbers = #tpu.dot_dimension_numbers<[1], [0], [0], [1], [0, 0, 1, 1], [], []>} : vector<8x32xbf16>, vector<32x32xbf16>, vector<8x32xf32> -> vector<8x32xf32>
    %c1_170 = arith.constant 1 : index
    %c3_171 = arith.constant 3 : index
    %c0_172 = arith.constant 0 : index
    %c0_173 = arith.constant 0 : index
    %208 = vector.load %arg7[%c1_170, %c3_171, %c0_172, %c0_173] : memref<2x7x32x32xbf16, #tpu.memory_space<vmem>>, vector<1x1x32x32xbf16>
    %209 = vector.shape_cast %208 : vector<1x1x32x32xbf16> to vector<32x32xbf16>
    %cst_174 = arith.constant dense<0.000000e+00> : vector<8x32xf32>
    %210 = tpu.matmul %148, %209, %cst_174 {dimension_numbers = #tpu.dot_dimension_numbers<[1], [0], [0], [1], [0, 0, 1, 1], [], []>} : vector<8x32xbf16>, vector<32x32xbf16>, vector<8x32xf32> -> vector<8x32xf32>
    %c3_i32_175 = arith.constant 3 : i32
    %211 = vector.broadcast %c3_i32_175 : i32 to vector<8x32xi32>
    %212 = arith.cmpi sge, %13, %211 : vector<8x32xi32>
    %c3_i32_176 = arith.constant 3 : i32
    %213 = tpu.dynamic_rotate %207 by %c3_i32_176 dim 0 : vector<8x32xf32>, i32 -> vector<8x32xf32>
    %cst_177 = arith.constant 0.000000e+00 : f32
    %214 = vector.broadcast %cst_177 : f32 to vector<8x32xf32>
    %215 = arith.select %212, %213, %214 : vector<8x32xi1>, vector<8x32xf32>
    %c3_i32_178 = arith.constant 3 : i32
    %216 = vector.broadcast %c3_i32_178 : i32 to vector<8x32xi32>
    %217 = arith.cmpi sge, %13, %216 : vector<8x32xi32>
    %c3_i32_179 = arith.constant 3 : i32
    %218 = tpu.dynamic_rotate %210 by %c3_i32_179 dim 0 : vector<8x32xf32>, i32 -> vector<8x32xf32>
    %cst_180 = arith.constant 0.000000e+00 : f32
    %219 = vector.broadcast %cst_180 : f32 to vector<8x32xf32>
    %220 = arith.select %217, %218, %219 : vector<8x32xi1>, vector<8x32xf32>
    %221 = arith.addf %203, %215 : vector<8x32xf32>
    %222 = arith.addf %204, %220 : vector<8x32xf32>
    %c1_181 = arith.constant 1 : index
    %c4_182 = arith.constant 4 : index
    %c0_183 = arith.constant 0 : index
    %c0_184 = arith.constant 0 : index
    %223 = vector.load %arg6[%c1_181, %c4_182, %c0_183, %c0_184] : memref<2x7x32x32xbf16, #tpu.memory_space<vmem>>, vector<1x1x32x32xbf16>
    %224 = vector.shape_cast %223 : vector<1x1x32x32xbf16> to vector<32x32xbf16>
    %cst_185 = arith.constant dense<0.000000e+00> : vector<8x32xf32>
    %225 = tpu.matmul %148, %224, %cst_185 {dimension_numbers = #tpu.dot_dimension_numbers<[1], [0], [0], [1], [0, 0, 1, 1], [], []>} : vector<8x32xbf16>, vector<32x32xbf16>, vector<8x32xf32> -> vector<8x32xf32>
    %c1_186 = arith.constant 1 : index
    %c4_187 = arith.constant 4 : index
    %c0_188 = arith.constant 0 : index
    %c0_189 = arith.constant 0 : index
    %226 = vector.load %arg7[%c1_186, %c4_187, %c0_188, %c0_189] : memref<2x7x32x32xbf16, #tpu.memory_space<vmem>>, vector<1x1x32x32xbf16>
    %227 = vector.shape_cast %226 : vector<1x1x32x32xbf16> to vector<32x32xbf16>
    %cst_190 = arith.constant dense<0.000000e+00> : vector<8x32xf32>
    %228 = tpu.matmul %148, %227, %cst_190 {dimension_numbers = #tpu.dot_dimension_numbers<[1], [0], [0], [1], [0, 0, 1, 1], [], []>} : vector<8x32xbf16>, vector<32x32xbf16>, vector<8x32xf32> -> vector<8x32xf32>
    %c2_i32_191 = arith.constant 2 : i32
    %229 = vector.broadcast %c2_i32_191 : i32 to vector<8x32xi32>
    %230 = arith.cmpi sge, %13, %229 : vector<8x32xi32>
    %c2_i32_192 = arith.constant 2 : i32
    %231 = tpu.dynamic_rotate %225 by %c2_i32_192 dim 0 : vector<8x32xf32>, i32 -> vector<8x32xf32>
    %cst_193 = arith.constant 0.000000e+00 : f32
    %232 = vector.broadcast %cst_193 : f32 to vector<8x32xf32>
    %233 = arith.select %230, %231, %232 : vector<8x32xi1>, vector<8x32xf32>
    %c2_i32_194 = arith.constant 2 : i32
    %234 = vector.broadcast %c2_i32_194 : i32 to vector<8x32xi32>
    %235 = arith.cmpi sge, %13, %234 : vector<8x32xi32>
    %c2_i32_195 = arith.constant 2 : i32
    %236 = tpu.dynamic_rotate %228 by %c2_i32_195 dim 0 : vector<8x32xf32>, i32 -> vector<8x32xf32>
    %cst_196 = arith.constant 0.000000e+00 : f32
    %237 = vector.broadcast %cst_196 : f32 to vector<8x32xf32>
    %238 = arith.select %235, %236, %237 : vector<8x32xi1>, vector<8x32xf32>
    %239 = arith.addf %221, %233 : vector<8x32xf32>
    %240 = arith.addf %222, %238 : vector<8x32xf32>
    %c1_197 = arith.constant 1 : index
    %c5_198 = arith.constant 5 : index
    %c0_199 = arith.constant 0 : index
    %c0_200 = arith.constant 0 : index
    %241 = vector.load %arg6[%c1_197, %c5_198, %c0_199, %c0_200] : memref<2x7x32x32xbf16, #tpu.memory_space<vmem>>, vector<1x1x32x32xbf16>
    %242 = vector.shape_cast %241 : vector<1x1x32x32xbf16> to vector<32x32xbf16>
    %cst_201 = arith.constant dense<0.000000e+00> : vector<8x32xf32>
    %243 = tpu.matmul %148, %242, %cst_201 {dimension_numbers = #tpu.dot_dimension_numbers<[1], [0], [0], [1], [0, 0, 1, 1], [], []>} : vector<8x32xbf16>, vector<32x32xbf16>, vector<8x32xf32> -> vector<8x32xf32>
    %c1_202 = arith.constant 1 : index
    %c5_203 = arith.constant 5 : index
    %c0_204 = arith.constant 0 : index
    %c0_205 = arith.constant 0 : index
    %244 = vector.load %arg7[%c1_202, %c5_203, %c0_204, %c0_205] : memref<2x7x32x32xbf16, #tpu.memory_space<vmem>>, vector<1x1x32x32xbf16>
    %245 = vector.shape_cast %244 : vector<1x1x32x32xbf16> to vector<32x32xbf16>
    %cst_206 = arith.constant dense<0.000000e+00> : vector<8x32xf32>
    %246 = tpu.matmul %148, %245, %cst_206 {dimension_numbers = #tpu.dot_dimension_numbers<[1], [0], [0], [1], [0, 0, 1, 1], [], []>} : vector<8x32xbf16>, vector<32x32xbf16>, vector<8x32xf32> -> vector<8x32xf32>
    %c1_i32_207 = arith.constant 1 : i32
    %247 = vector.broadcast %c1_i32_207 : i32 to vector<8x32xi32>
    %248 = arith.cmpi sge, %13, %247 : vector<8x32xi32>
    %c1_i32_208 = arith.constant 1 : i32
    %249 = tpu.dynamic_rotate %243 by %c1_i32_208 dim 0 : vector<8x32xf32>, i32 -> vector<8x32xf32>
    %cst_209 = arith.constant 0.000000e+00 : f32
    %250 = vector.broadcast %cst_209 : f32 to vector<8x32xf32>
    %251 = arith.select %248, %249, %250 : vector<8x32xi1>, vector<8x32xf32>
    %c1_i32_210 = arith.constant 1 : i32
    %252 = vector.broadcast %c1_i32_210 : i32 to vector<8x32xi32>
    %253 = arith.cmpi sge, %13, %252 : vector<8x32xi32>
    %c1_i32_211 = arith.constant 1 : i32
    %254 = tpu.dynamic_rotate %246 by %c1_i32_211 dim 0 : vector<8x32xf32>, i32 -> vector<8x32xf32>
    %cst_212 = arith.constant 0.000000e+00 : f32
    %255 = vector.broadcast %cst_212 : f32 to vector<8x32xf32>
    %256 = arith.select %253, %254, %255 : vector<8x32xi1>, vector<8x32xf32>
    %257 = arith.addf %239, %251 : vector<8x32xf32>
    %258 = arith.addf %240, %256 : vector<8x32xf32>
    %c1_213 = arith.constant 1 : index
    %c6_214 = arith.constant 6 : index
    %c0_215 = arith.constant 0 : index
    %c0_216 = arith.constant 0 : index
    %259 = vector.load %arg6[%c1_213, %c6_214, %c0_215, %c0_216] : memref<2x7x32x32xbf16, #tpu.memory_space<vmem>>, vector<1x1x32x32xbf16>
    %260 = vector.shape_cast %259 : vector<1x1x32x32xbf16> to vector<32x32xbf16>
    %cst_217 = arith.constant dense<0.000000e+00> : vector<8x32xf32>
    %261 = tpu.matmul %148, %260, %cst_217 {dimension_numbers = #tpu.dot_dimension_numbers<[1], [0], [0], [1], [0, 0, 1, 1], [], []>} : vector<8x32xbf16>, vector<32x32xbf16>, vector<8x32xf32> -> vector<8x32xf32>
    %c1_218 = arith.constant 1 : index
    %c6_219 = arith.constant 6 : index
    %c0_220 = arith.constant 0 : index
    %c0_221 = arith.constant 0 : index
    %262 = vector.load %arg7[%c1_218, %c6_219, %c0_220, %c0_221] : memref<2x7x32x32xbf16, #tpu.memory_space<vmem>>, vector<1x1x32x32xbf16>
    %263 = vector.shape_cast %262 : vector<1x1x32x32xbf16> to vector<32x32xbf16>
    %cst_222 = arith.constant dense<0.000000e+00> : vector<8x32xf32>
    %264 = tpu.matmul %148, %263, %cst_222 {dimension_numbers = #tpu.dot_dimension_numbers<[1], [0], [0], [1], [0, 0, 1, 1], [], []>} : vector<8x32xbf16>, vector<32x32xbf16>, vector<8x32xf32> -> vector<8x32xf32>
    %265 = arith.addf %257, %261 : vector<8x32xf32>
    %266 = arith.addf %258, %264 : vector<8x32xf32>
    %c1_223 = arith.constant 1 : index
    %c0_224 = arith.constant 0 : index
    %c0_225 = arith.constant 0 : index
    %267 = vector.load %arg8[%c1_223, %c0_224, %c0_225] : memref<2x1x32xf32, #tpu.memory_space<vmem>>, vector<1x1x32xf32>
    %268 = vector.shape_cast %267 : vector<1x1x32xf32> to vector<1x32xf32>
    %269 = vector.broadcast %268 : vector<1x32xf32> to vector<8x32xf32>
    %270 = arith.addf %265, %269 : vector<8x32xf32>
    %c1_226 = arith.constant 1 : index
    %c0_227 = arith.constant 0 : index
    %c0_228 = arith.constant 0 : index
    %271 = vector.load %arg9[%c1_226, %c0_227, %c0_228] : memref<2x1x32xf32, #tpu.memory_space<vmem>>, vector<1x1x32xf32>
    %272 = vector.shape_cast %271 : vector<1x1x32xf32> to vector<1x32xf32>
    %273 = vector.broadcast %272 : vector<1x32xf32> to vector<8x32xf32>
    %274 = arith.addf %266, %273 : vector<8x32xf32>
    %275 = arith.negf %274 : vector<8x32xf32>
    %276 = math.exp %275 : vector<8x32xf32>
    %cst_229 = arith.constant 1.000000e+00 : f32
    %277 = vector.broadcast %cst_229 : f32 to vector<8x32xf32>
    %278 = arith.addf %277, %276 : vector<8x32xf32>
    %279 = arith.divf %277, %278 : vector<8x32xf32>
    %280 = arith.mulf %270, %279 : vector<8x32xf32>
    %281 = arith.addf %280, %147 : vector<8x32xf32>
    %c0_230 = arith.constant 0 : index
    %c0_231 = arith.constant 0 : index
    %c0_232 = arith.constant 0 : index
    %282 = vector.load %arg10[%c0_230, %c0_231, %c0_232] : memref<1x8x32xf32, #tpu.memory_space<vmem>>, vector<1x8x32xf32>
    %283 = vector.shape_cast %282 : vector<1x8x32xf32> to vector<8x32xf32>
    %284 = vector.shape_cast %281 : vector<8x32xf32> to vector<1x8x32xf32>
    tpu.vector_store %arg10[%c0_230, %c0_231, %c0_232], %284 {strides = array<i32>} : memref<1x8x32xf32, #tpu.memory_space<vmem>>, vector<1x8x32xf32>,
    return
  }
  func.func @transform_0(%arg0: i32) -> (i32, i32, i32) {
    %c0_i32 = arith.constant 0 : i32
    %c0_i32_0 = arith.constant 0 : i32
    %c0_i32_1 = arith.constant 0 : i32
    return %arg0, %c0_i32, %c0_i32_0 : i32, i32, i32
  }
  func.func @transform_1(%arg0: i32) -> (i32, i32, i32) {
    %c0_i32 = arith.constant 0 : i32
    %c0_i32_0 = arith.constant 0 : i32
    %c0_i32_1 = arith.constant 0 : i32
    return %arg0, %c0_i32, %c0_i32_0 : i32, i32, i32
  }
  func.func @transform_2(%arg0: i32) -> (i32, i32) {
    %c0_i32 = arith.constant 0 : i32
    %c0_i32_0 = arith.constant 0 : i32
    %c0_i32_1 = arith.constant 0 : i32
    return %c0_i32, %c0_i32_0 : i32, i32
  }
  func.func @transform_3(%arg0: i32) -> (i32, i32) {
    %c0_i32 = arith.constant 0 : i32
    %c0_i32_0 = arith.constant 0 : i32
    %c0_i32_1 = arith.constant 0 : i32
    return %c0_i32, %c0_i32_0 : i32, i32
  }
  func.func @transform_4(%arg0: i32) -> (i32, i32) {
    %c0_i32 = arith.constant 0 : i32
    %c0_i32_0 = arith.constant 0 : i32
    %c0_i32_1 = arith.constant 0 : i32
    return %c0_i32, %c0_i32_0 : i32, i32
  }
  func.func @transform_5(%arg0: i32) -> (i32, i32, i32, i32) {
    %c0_i32 = arith.constant 0 : i32
    %c0_i32_0 = arith.constant 0 : i32
    %c0_i32_1 = arith.constant 0 : i32
    %c0_i32_2 = arith.constant 0 : i32
    %c0_i32_3 = arith.constant 0 : i32
    return %c0_i32, %c0_i32_0, %c0_i32_1, %c0_i32_2 : i32, i32, i32, i32
  }
  func.func @transform_6(%arg0: i32) -> (i32, i32, i32, i32) {
    %c0_i32 = arith.constant 0 : i32
    %c0_i32_0 = arith.constant 0 : i32
    %c0_i32_1 = arith.constant 0 : i32
    %c0_i32_2 = arith.constant 0 : i32
    %c0_i32_3 = arith.constant 0 : i32
    return %c0_i32, %c0_i32_0, %c0_i32_1, %c0_i32_2 : i32, i32, i32, i32
  }
  func.func @transform_7(%arg0: i32) -> (i32, i32, i32) {
    %c0_i32 = arith.constant 0 : i32
    %c0_i32_0 = arith.constant 0 : i32
    %c0_i32_1 = arith.constant 0 : i32
    %c0_i32_2 = arith.constant 0 : i32
    return %c0_i32, %c0_i32_0, %c0_i32_1 : i32, i32, i32
  }
  func.func @transform_8(%arg0: i32) -> (i32, i32, i32) {
    %c0_i32 = arith.constant 0 : i32
    %c0_i32_0 = arith.constant 0 : i32
    %c0_i32_1 = arith.constant 0 : i32
    %c0_i32_2 = arith.constant 0 : i32
    return %c0_i32, %c0_i32_0, %c0_i32_1 : i32, i32, i32
  }
  func.func @transform_9(%arg0: i32) -> (i32, i32, i32) {
    %c0_i32 = arith.constant 0 : i32
    %c0_i32_0 = arith.constant 0 : i32
    %c0_i32_1 = arith.constant 0 : i32
    return %arg0, %c0_i32, %c0_i32_0 : i32, i32, i32
  }
}

module attributes {stable_mosaic.version = 11 : i64} {
  func.func @_dual_linear_kernel(%arg0: i32, %arg1: i32, %arg2: memref<16x32xbf16, #tpu.memory_space<vmem>>, %arg3: memref<16x32xbf16, #tpu.memory_space<vmem>>, %arg4: memref<32x128xbf16, #tpu.memory_space<vmem>>, %arg5: memref<32x128xbf16, #tpu.memory_space<vmem>>, %arg6: memref<1x128xf32, #tpu.memory_space<vmem>>, %arg7: memref<16x128xf32, #tpu.memory_space<vmem>>) attributes {dimension_semantics = [#tpu.dimension_semantics<parallel>, #tpu.dimension_semantics<parallel>], iteration_bounds = array<i64: 1, 1>, scalar_prefetch = 0 : i64, scratch_operands = 0 : i64, tpu.core_type = #tpu.core_type<tc>, window_params = [{transform_indices = @transform_0, window_bounds = array<i64: 16, 32>}, {transform_indices = @transform_1, window_bounds = array<i64: 16, 32>}, {transform_indices = @transform_2, window_bounds = array<i64: 32, 128>}, {transform_indices = @transform_3, window_bounds = array<i64: 32, 128>}, {transform_indices = @transform_4, window_bounds = array<i64: 1, 128>}, {transform_indices = @transform_5, window_bounds = array<i64: 16, 128>}]} {
    %c0 = arith.constant 0 : index
    %c0_0 = arith.constant 0 : index
    %0 = vector.load %arg2[%c0, %c0_0] : memref<16x32xbf16, #tpu.memory_space<vmem>>, vector<16x32xbf16>
    %c0_1 = arith.constant 0 : index
    %c0_2 = arith.constant 0 : index
    %1 = vector.load %arg4[%c0_1, %c0_2] : memref<32x128xbf16, #tpu.memory_space<vmem>>, vector<32x128xbf16>
    %cst = arith.constant dense<0.000000e+00> : vector<16x128xf32>
    %2 = tpu.matmul %0, %1, %cst {dimension_numbers = #tpu.dot_dimension_numbers<[1], [0], [0], [1], [0, 0, 1, 1], [], []>} : vector<16x32xbf16>, vector<32x128xbf16>, vector<16x128xf32> -> vector<16x128xf32>
    %c0_3 = arith.constant 0 : index
    %c0_4 = arith.constant 0 : index
    %3 = vector.load %arg3[%c0_3, %c0_4] : memref<16x32xbf16, #tpu.memory_space<vmem>>, vector<16x32xbf16>
    %c0_5 = arith.constant 0 : index
    %c0_6 = arith.constant 0 : index
    %4 = vector.load %arg5[%c0_5, %c0_6] : memref<32x128xbf16, #tpu.memory_space<vmem>>, vector<32x128xbf16>
    %cst_7 = arith.constant dense<0.000000e+00> : vector<16x128xf32>
    %5 = tpu.matmul %3, %4, %cst_7 {dimension_numbers = #tpu.dot_dimension_numbers<[1], [0], [0], [1], [0, 0, 1, 1], [], []>} : vector<16x32xbf16>, vector<32x128xbf16>, vector<16x128xf32> -> vector<16x128xf32>
    %6 = arith.addf %2, %5 : vector<16x128xf32>
    %c0_8 = arith.constant 0 : index
    %c0_9 = arith.constant 0 : index
    %7 = vector.load %arg6[%c0_8, %c0_9] : memref<1x128xf32, #tpu.memory_space<vmem>>, vector<1x128xf32>
    %8 = vector.broadcast %7 : vector<1x128xf32> to vector<16x128xf32>
    %9 = arith.addf %6, %8 : vector<16x128xf32>
    %c0_10 = arith.constant 0 : index
    %c0_11 = arith.constant 0 : index
    %10 = vector.load %arg7[%c0_10, %c0_11] : memref<16x128xf32, #tpu.memory_space<vmem>>, vector<16x128xf32>
    tpu.vector_store %arg7[%c0_10, %c0_11], %9 {strides = array<i32>} : memref<16x128xf32, #tpu.memory_space<vmem>>, vector<16x128xf32>,
    return
  }
  func.func @transform_0(%arg0: i32, %arg1: i32) -> (i32, i32) {
    %c0_i32 = arith.constant 0 : i32
    %c0_i32_0 = arith.constant 0 : i32
    return %arg0, %c0_i32 : i32, i32
  }
  func.func @transform_1(%arg0: i32, %arg1: i32) -> (i32, i32) {
    %c0_i32 = arith.constant 0 : i32
    %c0_i32_0 = arith.constant 0 : i32
    return %arg0, %c0_i32 : i32, i32
  }
  func.func @transform_2(%arg0: i32, %arg1: i32) -> (i32, i32) {
    %c0_i32 = arith.constant 0 : i32
    %c0_i32_0 = arith.constant 0 : i32
    return %c0_i32, %arg1 : i32, i32
  }
  func.func @transform_3(%arg0: i32, %arg1: i32) -> (i32, i32) {
    %c0_i32 = arith.constant 0 : i32
    %c0_i32_0 = arith.constant 0 : i32
    return %c0_i32, %arg1 : i32, i32
  }
  func.func @transform_4(%arg0: i32, %arg1: i32) -> (i32, i32) {
    %c0_i32 = arith.constant 0 : i32
    %c0_i32_0 = arith.constant 0 : i32
    return %c0_i32, %arg1 : i32, i32
  }
  func.func @transform_5(%arg0: i32, %arg1: i32) -> (i32, i32) {
    %c0_i32 = arith.constant 0 : i32
    return %arg0, %arg1 : i32, i32
  }
}

</mosaic_0001>

<bundles_post_ra>
// kernel: tdconvd_forward.5
= control target key start
LH: loop header
LB: loop body
LE: loop exit
PB: predicated region body
PF: predicated region fallthrough
CT: control target
= control target key end

     0   :  { %v210_v0 = vmov 0.0   ;;  %vm211_vm0 = vmmov 0   ;;  %vm50_vm1 = vcmask 261120   ;;  %s269_s3 = inlined_call_operand.vmem [shape: bf16[32,128], index: 3, kind: input, shape index: {}]   ;;  %s270_s2 = inlined_call_operand.vmem [shape: bf16[32,128], index: 2, kind: input, shape index: {}]   ;;  %s271_s1 = inlined_call_operand.vmem [shape: bf16[16,32], index: 1, kind: input, shape index: {}]   ;;  %s272_s0 = inlined_call_operand.vmem [shape: bf16[16,32], index: 0, kind: input, shape index: {}]   ;;  %s273_s4 = inlined_call_operand.vmem [shape: f32[1,128], index: 4, kind: input, shape index: {}]   ;;  %s274_s5 = inlined_call_operand.vmem [shape: f32[16,128], index: 5, kind: output, shape index: {}]  }
   0x1   :  { %186 = vmatprep.subr.bf16.mxu0 %v210_v0  ;;  %194 = vmatprep.subr.bf16.mxu1 %v210_v0  ;;  %v204_v1 = vld [vmem:[%s269_s3] sm:$0xff]   ;;  %v206_v3 = vld [vmem:[%s269_s3 + $0x8] sm:$0xff]  }
   0x2   :  { %v205_v2 = vld [vmem:[%s270_s2] sm:$0xff]   ;;  %190 = vmatprep.mubr.msk.bf16.mxu0 %vm211_vm0, %v210_v0  ;;  %198 = vmatprep.mubr.msk.bf16.mxu1 %vm211_vm0, %v210_v0  ;;  %v207_v4 = vld [vmem:[%s270_s2 + $0x8] sm:$0xff]  }
   0x3   :  { %187 = vmatpush3.bf16.msra.mxu0 %v204_v1  ;;  %195 = vmatpush3.bf16.msra.mxu1 %v205_v2  ;;  %v208_v5 = vld [vmem:[%s271_s1] sm:$0xff]  }
   0x4   :  { %188 = vmatprep.subr.bf16.mxu0 %v210_v0  ;;  %196 = vmatprep.subr.bf16.mxu1 %v210_v0  ;;  %v209_v6 = vld [vmem:[%s272_s0] sm:$0xff]  }
   0x5   :  { %v179_v9 = vld [vmem:[%s273_s4] ss:$0 sm:$0xff] }
   0x7   :  { %189 = vmatpush3.bf16.msra.mxu0 %v206_v3  ;;  %197 = vmatpush3.bf16.msra.mxu1 %v207_v4 }
   0xa   :  { %191 = vmatmul.mubr.msk.bf16.vlgmr.msra.gmra.mrb[0].mxu0 %vm50_vm1, %v208_v5  ;;  %199 = vmatmul.mubr.msk.bf16.vlgmr.msra.gmra.mrb[0].mxu1 %vm50_vm1, %v209_v6 }
  0xdd   :  { %v88_v7 = vpop.f32.mrb[0].mxu0  ;;  %v149_v8 = vpop.f32.mrb[0].mxu1 }
  0xde   :  { %v192_v10 = vpop.f32.mrb[1].mxu0  ;;  %v150_v11 = vadd.f32 %v149_v8, %v88_v7  ;;  %v200_v12 = vpop.f32.mrb[1].mxu1 }
  0xdf   :  { %v91_v13 = vpop.f32.mrb[2].mxu0  ;;  %v152_v14 = vpop.f32.mrb[2].mxu1 }
  0xe0   :  { %v193_v15 = vpop.f32.mrb[3].mxu0  ;;  %v163_v16 = vadd.f32 %v179_v9, %v150_v11  ;;  %v153_v17 = vadd.f32 %v152_v14, %v91_v13  ;;  %v201_v18 = vpop.f32.mrb[3].mxu1 }
  0xe2   :  { %165 = vst [vmem:[%s274_s5] sm:$0xff] %v163_v16  ;;  %v164_v19 = vadd.f32 %v179_v9, %v153_v17 }
  0xe4   :  { %166 = vst [vmem:[%s274_s5 + $0x8] sm:$0xff] %v164_v19 }

// kernel: tdconvd_forward.4
= control target key start
LH: loop header
LB: loop body
LE: loop exit
PB: predicated region body
PF: predicated region fallthrough
CT: control target
= control target key end

     0   :  { %s558_s20 = smov 0   ;;  %s591_s0 = inlined_call_operand.vmem [shape: bf16[2,4,32], index: 0, kind: input, shape index: {}]   ;;  %s592_s1 = inlined_call_operand.vmem [shape: bf16[2,7,32], index: 1, kind: input, shape index: {}]   ;;  %s593_s2 = inlined_call_operand.vmem [shape: f32[1,32], index: 2, kind: input, shape index: {}]   ;;  %s594_s3 = inlined_call_operand.vmem [shape: f32[1,32], index: 3, kind: input, shape index: {}]   ;;  %s595_s4 = inlined_call_operand.<no memory space> [shape: f32[1,1], index: 4, kind: input, shape index: {}]   ;;  %s596_s5 = inlined_call_operand.vmem [shape: f32[2,7,32], index: 5, kind: output, shape index: {}]  }
   0x1   :  { %v10_v0 = vstv %s595_s4 }
   0x2   :  { %11 = vst [vmem:[#allocation2] sm:$0x1] %v10_v0 }
   0x3 LB: > { %s470_s21 = sadd.s32 4294967295, %s521_s20   ;;  %p474_p0 = scmp.ge.s32.totalorder %s521_s20, 1  ;;  %s521_s20 = sphi %s558_s20, %s17_s20  }
   0x4   : > { %p197_p1 = scmp.lt.s32.totalorder %s521_s20, 3 }
   0x6   : > { %p198_p2 = pnand %p474_p0, %p197_p1 }
   0x7   : > { %p227_p3 = scmp.lt.s32.totalorder (!%p198_p2), %s470_s21, 1  ;;  %v523_v1 = vmov (!%p198_p2), 0.0   ;;  %vm524_vm0 = vmmov (!%p198_p2), 0   ;;  %vm245_vm1 = vcmask (!%p198_p2), 261120   ;;  %v480_v5 = vld [vmem:[%s594_s3] ss:$0 sm:$0xff] (!%p198_p2)  ;;  %v334_v11 = vlaneseq (!%p198_p2) }
   0x8   : > { %201 = sbr.rel (%p198_p2) target bundleno = 773 (0x305), region = 40  ;;  %488 = vmatprep.subr.mxu0 (!%p198_p2), %v523_v1  ;;  %490 = vmatprep.mubr.msk.f32.mxu0 (!%p198_p2), %vm524_vm0, %v523_v1  ;;  %vm330_vm2 = vcmask (!%p198_p2), 260096   ;;  %v244_v8 = vld [vmem:[%s593_s2] sm:$0x1] (!%p198_p2)  ;;  %vm343_vm3 = vcmask (!%p198_p2), 30720   ;;  %vm360_vm4 = vcmask (!%p198_p2), 1041408  }
   0x9   : > { %v339_v2 = vld [vmem:[#allocation2] sm:$0x1] (!%p198_p2)  ;;  %493 = vmatprep.subr.bf16.mxu1 (!%p198_p2), %v523_v1  ;;  %495 = vmatprep.mubr.msk.bf16.mxu1 (!%p198_p2), %vm524_vm0, %v523_v1  ;;  %v335_v12 = vshrl.u32 (!%p198_p2), %v334_v11, 7  ;;  %vm356_vm5 = vcmask (!%p198_p2), 31744  }
   0xa   : > { %499 = vpush (!%p198_p2), %v339_v2 }
   0xb   : > { %v336_v13 = vsub.s32 (!%p198_p2), 0, %v335_v12 }
   0xf   : > { %s598_s21 = smov (!%p227_p3, %s470_s21), 1 }
  0x10   : > { %s475_s4 = sshll.u32 %s598_s21, 1  ;;  %s476_s22 = sshll.u32 %s598_s21, 2 }
  0x11   : > { %s230_s25 = scalar_lea.vmem %s591_s0, %s475_s4  ;;  %s234_s28 = scalar_lea.vmem %s592_s1, %s476_s22 }
  0x12   : > { %v240_v3 = vld [vmem:[%s230_s25] sm:$0x3]  ;;  %s477_s9 = sshll.u32 %s598_s21, 3 }
  0x13   : > { %v242_v4 = vld [vmem:[%s234_s28] sm:$0xf]  ;;  %v241_v6 = vunpack.c.l.bf16 %v240_v3  ;;  %v362_v27 = vsel %vm360_vm4, %v240_v3, 0  ;;  %s238_s12 = scalar_lea.vmem %s596_s5, %s477_s9 }
  0x14   : > { %v243_v7 = vunpack.c.l.bf16 %v242_v4  ;;  %494 = vmatpush3.bf16.msra.mxu1 %v362_v27 }
  0x15   : > { %489 = vmatpush3.xpose.msk.msra.mxu0 %vm245_vm1, %v241_v6 }
  0x16   : > { %v329_v9 = vmul.f32 %v480_v5, %v243_v7 }
  0x18   : > { %v331_v10 = vsel %vm330_vm2, %v329_v9, 0.0  ;;  %491 = vmatmul.mubr.msk.f32.vlgmr.msra.gmra.mrb[0].mxu0 %vm245_vm1, %v244_v8 }
  0x19   : > { %332 = vadd.xlane.f32.xlu0 %v331_v10 }
  0x3b   : > { %s500_s8 = spop %499 }
  0x3c   : > { %v341_v18 = vstv %s500_s8 }
  0xa6   : > { %v333_v15 = vpop.xlane.xlu0 %332 }
  0xeb   : > { %v318_v14 = vpop.f32.mrb[0].mxu0 }
  0xec   : > { %v337_v16 = vrot.slane %v318_v14, %v336_v13  ;;  %v492_v17 = vpop.f32.mrb[1].mxu0 }
  0xee   : > { %v338_v19 = vadd.f32 %v337_v16, %v333_v15 }
  0xf0   : > { %v342_v20 = vadd.f32 %v341_v18, %v338_v19 }
  0xf2   : > { %v344_v21 = vsel %vm343_vm3, %v342_v20, -inf }
  0xf3   : > { %345 = vmax.xlane.f32.xlu0 %v344_v21 }
 0x180   : > { %v346_v22 = vpop.xlane.xlu0 %345 }
 0x181   : > { %v347_v23 = vsub.f32 %v342_v20, %v346_v22 }
 0x183   : > { %v348_v24 = vmul.f32 1.442695, %v347_v23 }
 0x185   : > { %511 = vpow2.f32 %v348_v24 }
 0x18f   : > { %v512_v25 = vpop.eup %511 }
 0x190   : > { %v350_v26 = vsel %vm343_vm3, %v512_v25, 0.0 }
 0x191   : > { %351 = vadd.xlane.f32.xlu1 %v350_v26 }
 0x21e   : > { %v352_v28 = vpop.xlane.xlu1 %351 }
 0x21f   : > { %513 = vrcp.f32 %v352_v28 }
 0x229   : > { %v514_v29 = vpop.eup %513 }
 0x22a   : > { %v354_v30 = vmul.f32 %v514_v29, %v512_v25 }
 0x22c   : > { %v355_v31 = vpack.c.bf16 %v354_v30, %v354_v30 }
 0x22e   : > { %496 = vmatmul.mubr.msk.bf16.vlgmr.msra.gmra.mrb[0].mxu1 %vm356_vm5, %v355_v31 }
 0x301   : > { %v398_v32 = vpop.f32.mrb[0].mxu1 }
 0x302   : > { %404 = vst.msk [vmem:[%s238_s12] sm:$0x7f] %vm330_vm2, %v398_v32  ;;  %v497_v33 = vpop.f32.mrb[1].mxu1 }
 0x303   : > { %v401_v34 = vpop.f32.mrb[2].mxu1 }
 0x304   : > { %v498_v35 = vpop.f32.mrb[3].mxu1 }
 0x305 PF: > { %s17_s20 = sadd.s32 1, %s521_s20  }
 0x306   : > { %p14_p4 = scmp.ge.s32.totalorder %s17_s20, 4  }
 0x308   :  { %16 = sbr.rel (!%p14_p4) target bundleno = 3 (0x3), region = 73 }

// kernel: tdconvd_forward.3
= control target key start
LH: loop header
LB: loop body
LE: loop exit
PB: predicated region body
PF: predicated region fallthrough
CT: control target
= control target key end

     0   :  { %s2943_s30 = smov 0   ;;  %s3408_s0 = inlined_call_operand.vmem [shape: bf16[2,1,32], index: 0, kind: input, shape index: {}]   ;;  %s3409_s1 = inlined_call_operand.vmem [shape: bf16[2,8,16], index: 1, kind: input, shape index: {}]   ;;  %s3410_s2 = inlined_call_operand.vmem [shape: bf16[32,32], index: 2, kind: input, shape index: {}]   ;;  %s3411_s3 = inlined_call_operand.vmem [shape: bf16[16,32], index: 3, kind: input, shape index: {}]   ;;  %s3412_s4 = inlined_call_operand.vmem [shape: f32[1,32], index: 4, kind: input, shape index: {}]   ;;  %s3413_s5 = inlined_call_operand.vmem [shape: bf16[2,7,32,32], index: 5, kind: input, shape index: {}]   ;;  %s3414_s6 = inlined_call_operand.vmem [shape: bf16[2,7,32,32], index: 6, kind: input, shape index: {}]   ;;  %s3415_s7 = inlined_call_operand.vmem [shape: f32[2,1,32], index: 7, kind: input, shape index: {}]   ;;  %s3416_s8 = inlined_call_operand.vmem [shape: f32[2,1,32], index: 8, kind: input, shape index: {}]   ;;  %s3417_s9 = inlined_call_operand.vmem [shape: f32[2,8,32], index: 9, kind: output, shape index: {}]  }
   0x1 LB: > { %s2268_s10 = sadd.s32 4294967295, %s2889_s30   ;;  %p2272_p0 = scmp.ge.s32.totalorder %s2889_s30, 1  ;;  %s2889_s30 = sphi %s2943_s30, %s19_s30  }
   0x2   : > { %p294_p1 = scmp.lt.s32.totalorder %s2889_s30, 3 }
   0x4   : > { %p295_p2 = pnand %p2272_p0, %p294_p1 }
   0x5   : > { %v2816_v0 = vld [vmem:[%s3410_s2] sm:$0xff] (!%p295_p2)   ;;  %v2891_v1 = vmov (!%p295_p2), 0.0   ;;  %v2818_v3 = vld [vmem:[%s3410_s2 + $0x8] sm:$0xff] (!%p295_p2)   ;;  %vm2892_vm0 = vmmov (!%p295_p2), 0   ;;  %p331_p3 = scmp.lt.s32.totalorder (!%p295_p2), %s2268_s10, 1  ;;  %vm417_vm1 = vcmask (!%p295_p2), 130048   ;;  %v407_v10 = vlaneseq (!%p295_p2) }
   0x6   : > { %298 = sbr.rel (%p295_p2) target bundleno = 827 (0x33b), region = 56  ;;  %2568 = vmatprep.subr.bf16.mxu0 (!%p295_p2), %v2891_v1  ;;  %2576 = vmatprep.subr.bf16.mxu1 (!%p295_p2), %v2891_v1  ;;  %v2817_v2 = vld [vmem:[%s3411_s3] sm:$0xff] (!%p295_p2)   ;;  %vm360_vm2 = vcmask (!%p295_p2), 261120   ;;  %v2821_v8 = vld [vmem:[%s3414_s6 + $0x8] sm:$0xff] (!%p295_p2)   ;;  %v2823_v25 = vld [vmem:[%s3414_s6 + $0x10] sm:$0xff] (!%p295_p2)  }
   0x7   : > { %2569 = vmatpush3.bf16.msra.mxu0 (!%p295_p2), %v2816_v0  ;;  %2578 = vmatprep.mubr.msk.bf16.mxu1 (!%p295_p2), %vm2892_vm0, %v2891_v1  ;;  %v2819_v6 = vld [vmem:[%s3414_s6] sm:$0xff] (!%p295_p2)   ;;  %v2822_v9 = vld [vmem:[%s3413_s5 + $0x8] sm:$0xff] (!%p295_p2)   ;;  %v3000_v11 = vshrl.u32 (!%p295_p2), %v407_v10, 7  ;;  %v2824_v26 = vld [vmem:[%s3413_s5 + $0x10] sm:$0xff] (!%p295_p2)  }
   0x8   : > { %2570 = vmatprep.subr.bf16.mxu0 (!%p295_p2), %v2891_v1  ;;  %2577 = vmatpush3.bf16.msra.mxu1 (!%p295_p2), %v2817_v2  ;;  %v2820_v7 = vld [vmem:[%s3413_s5] sm:$0xff] (!%p295_p2)   ;;  %v2825_v28 = vld [vmem:[%s3414_s6 + $0x18] sm:$0xff] (!%p295_p2)   ;;  %v2829_v32 = vld [vmem:[%s3414_s6 + $0x28] sm:$0xff] (!%p295_p2)  }
   0x9   : > { %2572 = vmatprep.mubr.msk.bf16.mxu0 (!%p295_p2), %vm2892_vm0, %v2891_v1  ;;  %2582 = vmatprep.subr.bf16.mxu1 (!%p295_p2), %v2891_v1  ;;  %v409_v12 = vsub.s32 (!%p295_p2), 0, %v3000_v11  ;;  %v2280_v19 = vld [vmem:[%s3412_s4] ss:$0 sm:$0xff] (!%p295_p2)  ;;  %v2826_v29 = vld [vmem:[%s3413_s5 + $0x18] sm:$0xff] (!%p295_p2)   ;;  %v2830_v33 = vld [vmem:[%s3413_s5 + $0x28] sm:$0xff] (!%p295_p2)   ;;  %vm587_vm3 = vcmp.ge.s32.totalorder (!%p295_p2), %v3000_v11, 6 }
   0xa   : > { %v2827_v30 = vld [vmem:[%s3414_s6 + $0x20] sm:$0xff] (!%p295_p2)   ;;  %v2831_v34 = vld [vmem:[%s3414_s6 + $0x30] sm:$0xff] (!%p295_p2)   ;;  %v2833_v36 = vld [vmem:[%s3414_s6 + $0x38] sm:$0xff] (!%p295_p2)   ;;  %vm708_vm4 = vcmp.ge.s32.totalorder (!%p295_p2), %v3000_v11, 5  ;;  %vm829_vm5 = vcmp.ge.s32.totalorder (!%p295_p2), %v3000_v11, 4  ;;  %vm950_vm6 = vcmp.ge.s32.totalorder (!%p295_p2), %v3000_v11, 3 }
   0xb   : > { %2571 = vmatpush3.bf16.msra.mxu0 (!%p295_p2), %v2818_v3  ;;  %v2828_v31 = vld [vmem:[%s3413_s5 + $0x20] sm:$0xff] (!%p295_p2)   ;;  %v2832_v35 = vld [vmem:[%s3413_s5 + $0x30] sm:$0xff] (!%p295_p2)   ;;  %v2834_v37 = vld [vmem:[%s3413_s5 + $0x38] sm:$0xff] (!%p295_p2)   ;;  %vm1071_vm7 = vcmp.ge.s32.totalorder (!%p295_p2), %v3000_v11, 2  ;;  %vm1192_vm8 = vcmp.ge.s32.totalorder (!%p295_p2), %v3000_v11, 1 }
   0xc   : > { %2590 = vmatprep.subr.bf16.mxu0 (!%p295_p2), %v2891_v1  ;;  %v2835_v38 = vld [vmem:[%s3414_s6 + $0x40] sm:$0xff] (!%p295_p2)   ;;  %v2837_v40 = vld [vmem:[%s3414_s6 + $0x48] sm:$0xff] (!%p295_p2)   ;;  %v2839_v42 = vld [vmem:[%s3414_s6 + $0x50] sm:$0xff] (!%p295_p2)  }
   0xd   : > { %s3419_s10 = smov (!%p331_p3, %s2268_s10), 1  ;;  %v2836_v39 = vld [vmem:[%s3413_s5 + $0x40] sm:$0xff]   ;;  %v2838_v41 = vld [vmem:[%s3413_s5 + $0x48] sm:$0xff]   ;;  %v2840_v43 = vld [vmem:[%s3413_s5 + $0x50] sm:$0xff]  }
   0xe   : > { %s2273_s17 = sshll.u32 %s3419_s10, 2  ;;  %s333_s23 = scalar_lea.vmem %s3408_s0, %s3419_s10  ;;  %v2841_v44 = vld [vmem:[%s3414_s6 + $0x58] sm:$0xff]   ;;  %v2843_v46 = vld [vmem:[%s3414_s6 + $0x60] sm:$0xff]   ;;  %v2845_v48 = vld [vmem:[%s3414_s6 + $0x68] sm:$0xff]  }
   0xf   : > { %s337_s20 = scalar_lea.vmem %s3409_s1, %s2273_s17  ;;  %v343_v5 = vld [vmem:[%s333_s23] sm:$0x1]  ;;  %v2842_v45 = vld [vmem:[%s3413_s5 + $0x58] sm:$0xff]   ;;  %v2846_v49 = vld [vmem:[%s3413_s5 + $0x68] sm:$0xff]   ;;  %s2274_s13 = sshll.u32 %s3419_s10, 3 }
  0x10   : > { %v404_v4 = vld [vmem:[%s337_s20] sm:$0xf]  ;;  %2573 = vmatmul.mubr.msk.bf16.vlgmr.msra.gmra.mrb[0].mxu0 %vm360_vm2, %v343_v5  ;;  %v2847_v50 = vld [vmem:[%s3414_s6 + $0x70] sm:$0xff]   ;;  %v2849_v52 = vld [vmem:[%s3414_s6 + $0x78] sm:$0xff]   ;;  %s341_s16 = scalar_lea.vmem %s3417_s9, %s2274_s13 }
  0x11   : > { %2579 = vmatmul.mubr.msk.bf16.vlgmr.msra.gmra.mrb[0].mxu1 %vm417_vm1, %v404_v4  ;;  %2594 = vmatprep.mubr.msk.bf16.mxu0 %vm2892_vm0, %v2891_v1  ;;  %v2844_v47 = vld [vmem:[%s3413_s5 + $0x60] sm:$0xff]   ;;  %v2848_v51 = vld [vmem:[%s3413_s5 + $0x70] sm:$0xff]   ;;  %v2850_v53 = vld [vmem:[%s3413_s5 + $0x78] sm:$0xff]  }
  0x12   : > { %2586 = vmatprep.mubr.msk.bf16.mxu1 %vm2892_vm0, %v2891_v1  ;;  %2591 = vmatpush3.bf16.msra.mxu0 %v2819_v6 }
  0x13   : > { %2583 = vmatpush3.bf16.msra.mxu1 %v2820_v7  ;;  %2592 = vmatprep.subr.bf16.mxu0 %v2891_v1 }
  0x14   : > { %2584 = vmatprep.subr.bf16.mxu1 %v2891_v1 }
  0x16   : > { %2593 = vmatpush3.bf16.msra.mxu0 %v2821_v8 }
  0x17   : > { %2585 = vmatpush3.bf16.msra.mxu1 %v2822_v9  ;;  %2606 = vmatprep.subr.bf16.mxu0 %v2891_v1 }
  0x18   : > { %2598 = vmatprep.subr.bf16.mxu1 %v2891_v1 }
  0xe3   : > { %v398_v14 = vpop.f32.mrb[0].mxu0 }
  0xe4   : > { %v455_v13 = vpop.f32.mrb[0].mxu1  ;;  %v410_v16 = vrot.slane %v398_v14, %v409_v12  ;;  %v2574_v17 = vpop.f32.mrb[1].mxu0 }
  0xe5   : > { %v2580_v15 = vpop.f32.mrb[1].mxu1  ;;  %v401_v20 = vpop.f32.mrb[2].mxu0 }
  0xe6   : > { %v458_v18 = vpop.f32.mrb[2].mxu1  ;;  %v456_v22 = vadd.f32 %v455_v13, %v410_v16  ;;  %v2575_v23 = vpop.f32.mrb[3].mxu0 }
  0xe7   : > { %v2581_v21 = vpop.f32.mrb[3].mxu1 }
  0xe8   : > { %v3006_v24 = vadd.f32 %v2280_v19, %v456_v22 }
  0xea   : > { %v3016_v27 = vpack.c.bf16 %v3006_v24, %v3006_v24 }
  0xec   : > { %2587 = vmatmul.mubr.msk.bf16.vlgmr.msra.gmra.mrb[4].mxu1 %vm360_vm2, %v3016_v27  ;;  %2595 = vmatmul.mubr.msk.bf16.vlgmr.msra.gmra.mrb[4].mxu0 %vm360_vm2, %v3016_v27 }
  0xed   : > { %2607 = vmatpush3.bf16.msra.mxu0 %v2823_v25  ;;  %2599 = vmatpush3.bf16.msra.mxu1 %v2824_v26 }
  0xee   : > { %2608 = vmatprep.subr.bf16.mxu0 %v2891_v1  ;;  %2600 = vmatprep.subr.bf16.mxu1 %v2891_v1 }
  0xef   : > { %2602 = vmatprep.mubr.msk.bf16.mxu1 %vm2892_vm0, %v2891_v1  ;;  %2610 = vmatprep.mubr.msk.bf16.mxu0 %vm2892_vm0, %v2891_v1 }
  0xf1   : > { %2609 = vmatpush3.bf16.msra.mxu0 %v2825_v28  ;;  %2601 = vmatpush3.bf16.msra.mxu1 %v2826_v29 }
  0xf2   : > { %2622 = vmatprep.subr.bf16.mxu0 %v2891_v1  ;;  %2614 = vmatprep.subr.bf16.mxu1 %v2891_v1 }
  0xf4   : > { %2603 = vmatmul.mubr.msk.bf16.vlgmr.msra.gmra.mrb[8].mxu1 %vm360_vm2, %v3016_v27  ;;  %2611 = vmatmul.mubr.msk.bf16.vlgmr.msra.gmra.mrb[8].mxu0 %vm360_vm2, %v3016_v27 }
  0xf5   : > { %2623 = vmatpush3.bf16.msra.mxu0 %v2827_v30  ;;  %2615 = vmatpush3.bf16.msra.mxu1 %v2828_v31 }
  0xf6   : > { %2624 = vmatprep.subr.bf16.mxu0 %v2891_v1  ;;  %2616 = vmatprep.subr.bf16.mxu1 %v2891_v1 }
  0xf7   : > { %2618 = vmatprep.mubr.msk.bf16.mxu1 %vm2892_vm0, %v2891_v1  ;;  %2626 = vmatprep.mubr.msk.bf16.mxu0 %vm2892_vm0, %v2891_v1 }
  0xf9   : > { %2625 = vmatpush3.bf16.msra.mxu0 %v2829_v32  ;;  %2617 = vmatpush3.bf16.msra.mxu1 %v2830_v33 }
  0xfa   : > { %2638 = vmatprep.subr.bf16.mxu0 %v2891_v1  ;;  %2630 = vmatprep.subr.bf16.mxu1 %v2891_v1 }
  0xfc   : > { %2619 = vmatmul.mubr.msk.bf16.vlgmr.msra.gmra.mrb[12].mxu1 %vm360_vm2, %v3016_v27  ;;  %2627 = vmatmul.mubr.msk.bf16.vlgmr.msra.gmra.mrb[12].mxu0 %vm360_vm2, %v3016_v27 }
  0xfd   : > { %2639 = vmatpush3.bf16.msra.mxu0 %v2831_v34  ;;  %2631 = vmatpush3.bf16.msra.mxu1 %v2832_v35 }
  0xfe   : > { %2640 = vmatprep.subr.bf16.mxu0 %v2891_v1  ;;  %2632 = vmatprep.subr.bf16.mxu1 %v2891_v1 }
  0xff   : > { %2634 = vmatprep.mubr.msk.bf16.mxu1 %vm2892_vm0, %v2891_v1  ;;  %2642 = vmatprep.mubr.msk.bf16.mxu0 %vm2892_vm0, %v2891_v1 }
 0x101   : > { %2641 = vmatpush3.bf16.msra.mxu0 %v2833_v36  ;;  %2633 = vmatpush3.bf16.msra.mxu1 %v2834_v37 }
 0x102   : > { %2654 = vmatprep.subr.bf16.mxu0 %v2891_v1  ;;  %2646 = vmatprep.subr.bf16.mxu1 %v2891_v1 }
 0x104   : > { %2635 = vmatmul.mubr.msk.bf16.vlgmr.msra.gmra.mrb[16].mxu1 %vm360_vm2, %v3016_v27  ;;  %2643 = vmatmul.mubr.msk.bf16.vlgmr.msra.gmra.mrb[16].mxu0 %vm360_vm2, %v3016_v27 }
 0x105   : > { %2655 = vmatpush3.bf16.msra.mxu0 %v2835_v38  ;;  %2647 = vmatpush3.bf16.msra.mxu1 %v2836_v39 }
 0x106   : > { %2656 = vmatprep.subr.bf16.mxu0 %v2891_v1  ;;  %2648 = vmatprep.subr.bf16.mxu1 %v2891_v1 }
 0x107   : > { %2650 = vmatprep.mubr.msk.bf16.mxu1 %vm2892_vm0, %v2891_v1  ;;  %2658 = vmatprep.mubr.msk.bf16.mxu0 %vm2892_vm0, %v2891_v1 }
 0x109   : > { %2657 = vmatpush3.bf16.msra.mxu0 %v2837_v40  ;;  %2649 = vmatpush3.bf16.msra.mxu1 %v2838_v41 }
 0x10a   : > { %2670 = vmatprep.subr.bf16.mxu0 %v2891_v1  ;;  %2662 = vmatprep.subr.bf16.mxu1 %v2891_v1 }
 0x10c   : > { %2651 = vmatmul.mubr.msk.bf16.vlgmr.msra.gmra.mrb[20].mxu1 %vm360_vm2, %v3016_v27  ;;  %2659 = vmatmul.mubr.msk.bf16.vlgmr.msra.gmra.mrb[20].mxu0 %vm360_vm2, %v3016_v27 }
 0x10d   : > { %2671 = vmatpush3.bf16.msra.mxu0 %v2839_v42  ;;  %2663 = vmatpush3.bf16.msra.mxu1 %v2840_v43 }
 0x10e   : > { %2672 = vmatprep.subr.bf16.mxu0 %v2891_v1  ;;  %2664 = vmatprep.subr.bf16.mxu1 %v2891_v1 }
 0x10f   : > { %2666 = vmatprep.mubr.msk.bf16.mxu1 %vm2892_vm0, %v2891_v1  ;;  %2674 = vmatprep.mubr.msk.bf16.mxu0 %vm2892_vm0, %v2891_v1 }
 0x111   : > { %2673 = vmatpush3.bf16.msra.mxu0 %v2841_v44  ;;  %2665 = vmatpush3.bf16.msra.mxu1 %v2842_v45 }
 0x112   : > { %2686 = vmatprep.subr.bf16.mxu0 %v2891_v1  ;;  %2678 = vmatprep.subr.bf16.mxu1 %v2891_v1 }
 0x114   : > { %2667 = vmatmul.mubr.msk.bf16.vlgmr.msra.gmra.mrb[24].mxu1 %vm360_vm2, %v3016_v27  ;;  %2675 = vmatmul.mubr.msk.bf16.vlgmr.msra.gmra.mrb[24].mxu0 %vm360_vm2, %v3016_v27 }
 0x115   : > { %2687 = vmatpush3.bf16.msra.mxu0 %v2843_v46  ;;  %2679 = vmatpush3.bf16.msra.mxu1 %v2844_v47 }
 0x116   : > { %2688 = vmatprep.subr.bf16.mxu0 %v2891_v1  ;;  %2680 = vmatprep.subr.bf16.mxu1 %v2891_v1 }
 0x117   : > { %2682 = vmatprep.mubr.msk.bf16.mxu1 %vm2892_vm0, %v2891_v1  ;;  %2690 = vmatprep.mubr.msk.bf16.mxu0 %vm2892_vm0, %v2891_v1 }
 0x119   : > { %2689 = vmatpush3.bf16.msra.mxu0 %v2845_v48  ;;  %2681 = vmatpush3.bf16.msra.mxu1 %v2846_v49 }
 0x11a   : > { %2702 = vmatprep.subr.bf16.mxu0 %v2891_v1  ;;  %2694 = vmatprep.subr.bf16.mxu1 %v2891_v1 }
 0x11c   : > { %2683 = vmatmul.mubr.msk.bf16.vlgmr.msra.gmra.mrb[28].mxu1 %vm360_vm2, %v3016_v27  ;;  %2691 = vmatmul.mubr.msk.bf16.vlgmr.msra.gmra.mrb[28].mxu0 %vm360_vm2, %v3016_v27 }
 0x11d   : > { %2698 = vmatprep.mubr.msk.bf16.mxu1 %vm2892_vm0, %v2891_v1  ;;  %2706 = vmatprep.mubr.msk.bf16.mxu0 %vm2892_vm0, %v2891_v1 }
 0x11e   : > { %2703 = vmatpush3.bf16.msra.mxu0 %v2847_v50  ;;  %2695 = vmatpush3.bf16.msra.mxu1 %v2848_v51 }
 0x11f   : > { %2704 = vmatprep.subr.bf16.mxu0 %v2891_v1  ;;  %2696 = vmatprep.subr.bf16.mxu1 %v2891_v1 }
 0x122   : > { %2705 = vmatpush3.bf16.msra.mxu0 %v2849_v52  ;;  %2697 = vmatpush3.bf16.msra.mxu1 %v2850_v53 }
 0x123   : > { %2718 = vmatprep.subr.bf16.mxu0 %v2891_v1  ;;  %2710 = vmatprep.subr.bf16.mxu1 %v2891_v1 }
 0x1bf   : > { %v525_v54 = vpop.f32.mrb[4].mxu1  ;;  %v581_v55 = vpop.f32.mrb[4].mxu0 }
 0x1c0   : > { %v2588_v56 = vpop.f32.mrb[5].mxu1  ;;  %v2596_v57 = vpop.f32.mrb[5].mxu0  ;;  %v588_v62 = vrot.slane %v525_v54, 2  ;;  %v590_v63 = vrot.slane %v581_v55, 2 }
 0x1c1   : > { %v528_v58 = vpop.f32.mrb[6].mxu1  ;;  %v584_v59 = vpop.f32.mrb[6].mxu0 }
 0x1c2   : > { %v2589_v60 = vpop.f32.mrb[7].mxu1  ;;  %v2597_v61 = vpop.f32.mrb[7].mxu0  ;;  %v589_v9 = vsel %vm587_vm3, %v588_v62, 0.0  ;;  %v591_v10 = vsel %vm587_vm3, %v590_v63, 0.0 }
 0x1c7   : > { %v645_v0 = vpop.f32.mrb[8].mxu1  ;;  %v702_v2 = vpop.f32.mrb[8].mxu0 }
 0x1c8   : > { %v709_v3 = vrot.slane %v645_v0, 3  ;;  %v711_v4 = vrot.slane %v702_v2, 3  ;;  %v2604_v5 = vpop.f32.mrb[9].mxu1  ;;  %v2612_v6 = vpop.f32.mrb[9].mxu0 }
 0x1c9   : > { %v648_v7 = vpop.f32.mrb[10].mxu1  ;;  %v705_v8 = vpop.f32.mrb[10].mxu0 }
 0x1ca   : > { %v710_v12 = vsel %vm708_vm4, %v709_v3, 0.0  ;;  %v712_v13 = vsel %vm708_vm4, %v711_v4, 0.0  ;;  %v2605_v14 = vpop.f32.mrb[11].mxu1  ;;  %v2613_v15 = vpop.f32.mrb[11].mxu0 }
 0x1cb   : > { %v713_v16 = vadd.f32 %v710_v12, %v589_v9  ;;  %v714_v17 = vadd.f32 %v712_v13, %v591_v10  ;;  %v2372_v15 = vld [vmem:[%s3416_s8] ss:$0 sm:$0xff] }
 0x1cf   : > { %v766_v18 = vpop.f32.mrb[12].mxu1  ;;  %v823_v19 = vpop.f32.mrb[12].mxu0 }
 0x1d0   : > { %v830_v20 = vrot.slane %v766_v18, 4  ;;  %v832_v21 = vrot.slane %v823_v19, 4  ;;  %v2620_v22 = vpop.f32.mrb[13].mxu1  ;;  %v2628_v23 = vpop.f32.mrb[13].mxu0 }
 0x1d1   : > { %v769_v25 = vpop.f32.mrb[14].mxu1  ;;  %v826_v26 = vpop.f32.mrb[14].mxu0 }
 0x1d2   : > { %v831_v27 = vsel %vm829_vm5, %v830_v20, 0.0  ;;  %v833_v28 = vsel %vm829_vm5, %v832_v21, 0.0  ;;  %v2621_v29 = vpop.f32.mrb[15].mxu1  ;;  %v2629_v30 = vpop.f32.mrb[15].mxu0 }
 0x1d3   : > { %v834_v31 = vadd.f32 %v831_v27, %v713_v16  ;;  %v835_v32 = vadd.f32 %v833_v28, %v714_v17  ;;  %v2371_v29 = vld [vmem:[%s3415_s7] ss:$0 sm:$0xff] }
 0x1d7   : > { %v887_v33 = vpop.f32.mrb[16].mxu1  ;;  %v944_v34 = vpop.f32.mrb[16].mxu0 }
 0x1d8   : > { %v951_v35 = vrot.slane %v887_v33, 5  ;;  %v953_v36 = vrot.slane %v944_v34, 5  ;;  %v2636_v37 = vpop.f32.mrb[17].mxu1  ;;  %v2644_v38 = vpop.f32.mrb[17].mxu0  ;;  %v2851_v34 = vld [vmem:[%s3414_s6 + $0x80] sm:$0xff]  }
 0x1d9   : > { %v890_v39 = vpop.f32.mrb[18].mxu1  ;;  %v947_v40 = vpop.f32.mrb[18].mxu0  ;;  %v2854_v37 = vld [vmem:[%s3413_s5 + $0x88] sm:$0xff]   ;;  %v2855_v38 = vld [vmem:[%s3414_s6 + $0x90] sm:$0xff]  }
 0x1da   : > { %v952_v41 = vsel %vm950_vm6, %v951_v35, 0.0  ;;  %v954_v42 = vsel %vm950_vm6, %v953_v36, 0.0  ;;  %v2637_v43 = vpop.f32.mrb[19].mxu1  ;;  %v2645_v44 = vpop.f32.mrb[19].mxu0  ;;  %v2852_v35 = vld [vmem:[%s3413_s5 + $0x80] sm:$0xff]   ;;  %v2856_v39 = vld [vmem:[%s3413_s5 + $0x90] sm:$0xff]  }
 0x1db   : > { %v955_v45 = vadd.f32 %v952_v41, %v834_v31  ;;  %v956_v46 = vadd.f32 %v954_v42, %v835_v32  ;;  %v2857_v40 = vld [vmem:[%s3414_s6 + $0x98] sm:$0xff]   ;;  %v2859_v42 = vld [vmem:[%s3414_s6 + $0xa0] sm:$0xff]   ;;  %v2861_v44 = vld [vmem:[%s3414_s6 + $0xa8] sm:$0xff]  }
 0x1dc   : > { %v2858_v41 = vld [vmem:[%s3413_s5 + $0x98] sm:$0xff]   ;;  %v2860_v43 = vld [vmem:[%s3413_s5 + $0xa0] sm:$0xff]  }
 0x1df   : > { %v1008_v47 = vpop.f32.mrb[20].mxu1  ;;  %v1065_v48 = vpop.f32.mrb[20].mxu0 }
 0x1e0   : > { %v1072_v49 = vrot.slane %v1008_v47, 6  ;;  %v1074_v50 = vrot.slane %v1065_v48, 6  ;;  %v2652_v51 = vpop.f32.mrb[21].mxu1  ;;  %v2660_v52 = vpop.f32.mrb[21].mxu0  ;;  %v2864_v47 = vld [vmem:[%s3413_s5 + $0xb0] sm:$0xff]   ;;  %v2865_v48 = vld [vmem:[%s3414_s6 + $0xb8] sm:$0xff]  }
 0x1e1   : > { %v1011_v53 = vpop.f32.mrb[22].mxu1  ;;  %v1068_v54 = vpop.f32.mrb[22].mxu0  ;;  %v2868_v51 = vld [vmem:[%s3413_s5 + $0xc0] sm:$0xff]   ;;  %v2869_v52 = vld [vmem:[%s3414_s6 + $0xc8] sm:$0xff]  }
 0x1e2   : > { %v1073_v55 = vsel %vm1071_vm7, %v1072_v49, 0.0  ;;  %v1075_v56 = vsel %vm1071_vm7, %v1074_v50, 0.0  ;;  %v2653_v57 = vpop.f32.mrb[23].mxu1  ;;  %v2661_v58 = vpop.f32.mrb[23].mxu0  ;;  %v2866_v49 = vld [vmem:[%s3413_s5 + $0xb8] sm:$0xff]   ;;  %v2867_v50 = vld [vmem:[%s3414_s6 + $0xc0] sm:$0xff]  }
 0x1e3   : > { %v1076_v59 = vadd.f32 %v1073_v55, %v955_v45  ;;  %v1077_v60 = vadd.f32 %v1075_v56, %v956_v46  ;;  %v2862_v45 = vld [vmem:[%s3413_s5 + $0xa8] sm:$0xff]   ;;  %v2863_v46 = vld [vmem:[%s3414_s6 + $0xb0] sm:$0xff]   ;;  %v2873_v56 = vld [vmem:[%s3414_s6 + $0xd8] sm:$0xff]  }
 0x1e4   : > { %v2870_v53 = vld [vmem:[%s3413_s5 + $0xc8] sm:$0xff]   ;;  %v2871_v54 = vld [vmem:[%s3414_s6 + $0xd0] sm:$0xff]   ;;  %v2874_v57 = vld [vmem:[%s3413_s5 + $0xd8] sm:$0xff]  }
 0x1e5   : > { %v2872_v55 = vld [vmem:[%s3413_s5 + $0xd0] sm:$0xff]  }
 0x1e7   : > { %v1129_v61 = vpop.f32.mrb[24].mxu1  ;;  %v1186_v62 = vpop.f32.mrb[24].mxu0 }
 0x1e8   : > { %v1193_v63 = vrot.slane %v1129_v61, 7  ;;  %v1195_v0 = vrot.slane %v1186_v62, 7  ;;  %v2668_v2 = vpop.f32.mrb[25].mxu1  ;;  %v2676_v3 = vpop.f32.mrb[25].mxu0 }
 0x1e9   : > { %v1132_v4 = vpop.f32.mrb[26].mxu1  ;;  %v1189_v5 = vpop.f32.mrb[26].mxu0 }
 0x1ea   : > { %v1194_v6 = vsel %vm1192_vm8, %v1193_v63, 0.0  ;;  %v1196_v7 = vsel %vm1192_vm8, %v1195_v0, 0.0  ;;  %v2669_v8 = vpop.f32.mrb[27].mxu1  ;;  %v2677_v9 = vpop.f32.mrb[27].mxu0 }
 0x1eb   : > { %v1197_v10 = vadd.f32 %v1194_v6, %v1076_v59  ;;  %v1198_v12 = vadd.f32 %v1196_v7, %v1077_v60 }
 0x1ef   : > { %v1250_v13 = vpop.f32.mrb[28].mxu1  ;;  %v1307_v14 = vpop.f32.mrb[28].mxu0 }
 0x1f0   : > { %v1313_v16 = vadd.f32 %v1250_v13, %v1197_v10  ;;  %v1314_v17 = vadd.f32 %v1307_v14, %v1198_v12  ;;  %v2684_v18 = vpop.f32.mrb[29].mxu1  ;;  %v2692_v19 = vpop.f32.mrb[29].mxu0 }
 0x1f1   : > { %v1253_v20 = vpop.f32.mrb[30].mxu1  ;;  %v1310_v21 = vpop.f32.mrb[30].mxu0 }
 0x1f2   : > { %v1330_v22 = vadd.f32 %v2372_v15, %v1314_v17  ;;  %v2685_v23 = vpop.f32.mrb[31].mxu1  ;;  %v2693_v25 = vpop.f32.mrb[31].mxu0  ;;  %v1322_v30 = vadd.f32 %v2371_v29, %v1313_v16 }
 0x1f4   : > { %v2373_v26 = vmul.f32 -1.442695, %v1330_v22 }
 0x1f6   : > { %2875 = vpow2.f32 %v2373_v26 }
 0x200   : > { %v2876_v27 = vpop.eup %2875 }
 0x201   : > { %v1334_v28 = vadd.f32 1.0, %v2876_v27 }
 0x203   : > { %2877 = vrcp.f32 %v1334_v28 }
 0x20d   : > { %v2878_v31 = vpop.eup %2877 }
 0x20e   : > { %v1337_v32 = vmul.f32 %v2878_v31, %v1322_v30 }
 0x210   : > { %v3217_v33 = vadd.f32 %v1337_v32, %v3006_v24  ;;  %v2853_v24 = vld [vmem:[%s3414_s6 + $0x88] sm:$0xff]  }
 0x212   : > { %v3227_v36 = vpack.c.bf16 %v3217_v33, %v3217_v33 }
 0x214   : > { %2699 = vmatmul.mubr.msk.bf16.vlgmr.msra.gmra.mrb[32].mxu1 %vm360_vm2, %v3227_v36  ;;  %2707 = vmatmul.mubr.msk.bf16.vlgmr.msra.gmra.mrb[32].mxu0 %vm360_vm2, %v3227_v36 }
 0x215   : > { %2719 = vmatpush3.bf16.msra.mxu0 %v2851_v34  ;;  %2711 = vmatpush3.bf16.msra.mxu1 %v2852_v35 }
 0x216   : > { %2720 = vmatprep.subr.bf16.mxu0 %v2891_v1  ;;  %2712 = vmatprep.subr.bf16.mxu1 %v2891_v1 }
 0x217   : > { %2714 = vmatprep.mubr.msk.bf16.mxu1 %vm2892_vm0, %v2891_v1  ;;  %2722 = vmatprep.mubr.msk.bf16.mxu0 %vm2892_vm0, %v2891_v1 }
 0x219   : > { %2721 = vmatpush3.bf16.msra.mxu0 %v2853_v24  ;;  %2713 = vmatpush3.bf16.msra.mxu1 %v2854_v37 }
 0x21a   : > { %2734 = vmatprep.subr.bf16.mxu0 %v2891_v1  ;;  %2726 = vmatprep.subr.bf16.mxu1 %v2891_v1 }
 0x21c   : > { %2715 = vmatmul.mubr.msk.bf16.vlgmr.msra.gmra.mrb[36].mxu1 %vm360_vm2, %v3227_v36  ;;  %2723 = vmatmul.mubr.msk.bf16.vlgmr.msra.gmra.mrb[36].mxu0 %vm360_vm2, %v3227_v36 }
 0x21d   : > { %2735 = vmatpush3.bf16.msra.mxu0 %v2855_v38  ;;  %2727 = vmatpush3.bf16.msra.mxu1 %v2856_v39 }
 0x21e   : > { %2736 = vmatprep.subr.bf16.mxu0 %v2891_v1  ;;  %2728 = vmatprep.subr.bf16.mxu1 %v2891_v1 }
 0x21f   : > { %2730 = vmatprep.mubr.msk.bf16.mxu1 %vm2892_vm0, %v2891_v1  ;;  %2738 = vmatprep.mubr.msk.bf16.mxu0 %vm2892_vm0, %v2891_v1 }
 0x221   : > { %2737 = vmatpush3.bf16.msra.mxu0 %v2857_v40  ;;  %2729 = vmatpush3.bf16.msra.mxu1 %v2858_v41 }
 0x222   : > { %2750 = vmatprep.subr.bf16.mxu0 %v2891_v1  ;;  %2742 = vmatprep.subr.bf16.mxu1 %v2891_v1 }
 0x224   : > { %2731 = vmatmul.mubr.msk.bf16.vlgmr.msra.gmra.mrb[40].mxu1 %vm360_vm2, %v3227_v36  ;;  %2739 = vmatmul.mubr.msk.bf16.vlgmr.msra.gmra.mrb[40].mxu0 %vm360_vm2, %v3227_v36 }
 0x225   : > { %2751 = vmatpush3.bf16.msra.mxu0 %v2859_v42  ;;  %2743 = vmatpush3.bf16.msra.mxu1 %v2860_v43 }
 0x226   : > { %2752 = vmatprep.subr.bf16.mxu0 %v2891_v1  ;;  %2744 = vmatprep.subr.bf16.mxu1 %v2891_v1 }
 0x227   : > { %2746 = vmatprep.mubr.msk.bf16.mxu1 %vm2892_vm0, %v2891_v1  ;;  %2754 = vmatprep.mubr.msk.bf16.mxu0 %vm2892_vm0, %v2891_v1 }
 0x229   : > { %2753 = vmatpush3.bf16.msra.mxu0 %v2861_v44  ;;  %2745 = vmatpush3.bf16.msra.mxu1 %v2862_v45 }
 0x22a   : > { %2766 = vmatprep.subr.bf16.mxu0 %v2891_v1  ;;  %2758 = vmatprep.subr.bf16.mxu1 %v2891_v1 }
 0x22c   : > { %2747 = vmatmul.mubr.msk.bf16.vlgmr.msra.gmra.mrb[44].mxu1 %vm360_vm2, %v3227_v36  ;;  %2755 = vmatmul.mubr.msk.bf16.vlgmr.msra.gmra.mrb[44].mxu0 %vm360_vm2, %v3227_v36 }
 0x22d   : > { %2767 = vmatpush3.bf16.msra.mxu0 %v2863_v46  ;;  %2759 = vmatpush3.bf16.msra.mxu1 %v2864_v47 }
 0x22e   : > { %2768 = vmatprep.subr.bf16.mxu0 %v2891_v1  ;;  %2760 = vmatprep.subr.bf16.mxu1 %v2891_v1 }
 0x22f   : > { %2762 = vmatprep.mubr.msk.bf16.mxu1 %vm2892_vm0, %v2891_v1  ;;  %2770 = vmatprep.mubr.msk.bf16.mxu0 %vm2892_vm0, %v2891_v1 }
 0x231   : > { %2769 = vmatpush3.bf16.msra.mxu0 %v2865_v48  ;;  %2761 = vmatpush3.bf16.msra.mxu1 %v2866_v49 }
 0x232   : > { %2782 = vmatprep.subr.bf16.mxu0 %v2891_v1  ;;  %2774 = vmatprep.subr.bf16.mxu1 %v2891_v1 }
 0x234   : > { %2763 = vmatmul.mubr.msk.bf16.vlgmr.msra.gmra.mrb[48].mxu1 %vm360_vm2, %v3227_v36  ;;  %2771 = vmatmul.mubr.msk.bf16.vlgmr.msra.gmra.mrb[48].mxu0 %vm360_vm2, %v3227_v36 }
 0x235   : > { %2783 = vmatpush3.bf16.msra.mxu0 %v2867_v50  ;;  %2775 = vmatpush3.bf16.msra.mxu1 %v2868_v51 }
 0x236   : > { %2784 = vmatprep.subr.bf16.mxu0 %v2891_v1  ;;  %2776 = vmatprep.subr.bf16.mxu1 %v2891_v1 }
 0x237   : > { %2778 = vmatprep.mubr.msk.bf16.mxu1 %vm2892_vm0, %v2891_v1  ;;  %2786 = vmatprep.mubr.msk.bf16.mxu0 %vm2892_vm0, %v2891_v1 }
 0x239   : > { %2785 = vmatpush3.bf16.msra.mxu0 %v2869_v52  ;;  %2777 = vmatpush3.bf16.msra.mxu1 %v2870_v53 }
 0x23a   : > { %2798 = vmatprep.subr.bf16.mxu0 %v2891_v1  ;;  %2790 = vmatprep.subr.bf16.mxu1 %v2891_v1 }
 0x23c   : > { %2779 = vmatmul.mubr.msk.bf16.vlgmr.msra.gmra.mrb[52].mxu1 %vm360_vm2, %v3227_v36  ;;  %2787 = vmatmul.mubr.msk.bf16.vlgmr.msra.gmra.mrb[52].mxu0 %vm360_vm2, %v3227_v36 }
 0x23d   : > { %2799 = vmatpush3.bf16.msra.mxu0 %v2871_v54  ;;  %2791 = vmatpush3.bf16.msra.mxu1 %v2872_v55 }
 0x23e   : > { %2800 = vmatprep.subr.bf16.mxu0 %v2891_v1  ;;  %2792 = vmatprep.subr.bf16.mxu1 %v2891_v1 }
 0x23f   : > { %2794 = vmatprep.mubr.msk.bf16.mxu1 %vm2892_vm0, %v2891_v1  ;;  %2802 = vmatprep.mubr.msk.bf16.mxu0 %vm2892_vm0, %v2891_v1 }
 0x241   : > { %2801 = vmatpush3.bf16.msra.mxu0 %v2873_v56  ;;  %2793 = vmatpush3.bf16.msra.mxu1 %v2874_v57 }
 0x244   : > { %2795 = vmatmul.mubr.msk.bf16.vlgmr.msra.gmra.mrb[56].mxu1 %vm360_vm2, %v3227_v36  ;;  %2803 = vmatmul.mubr.msk.bf16.vlgmr.msra.gmra.mrb[56].mxu0 %vm360_vm2, %v3227_v36 }
 0x2e7   : > { %v1394_v58 = vpop.f32.mrb[32].mxu1  ;;  %v1451_v59 = vpop.f32.mrb[32].mxu0 }
 0x2e8   : > { %v2700_v60 = vpop.f32.mrb[33].mxu1  ;;  %v2708_v61 = vpop.f32.mrb[33].mxu0  ;;  %v1457_v3 = vrot.slane %v1394_v58, 2  ;;  %v1459_v4 = vrot.slane %v1451_v59, 2 }
 0x2e9   : > { %v1397_v62 = vpop.f32.mrb[34].mxu1  ;;  %v1454_v63 = vpop.f32.mrb[34].mxu0 }
 0x2ea   : > { %v2701_v0 = vpop.f32.mrb[35].mxu1  ;;  %v2709_v2 = vpop.f32.mrb[35].mxu0  ;;  %v1458_v13 = vsel %vm587_vm3, %v1457_v3, 0.0  ;;  %v1460_v14 = vsel %vm587_vm3, %v1459_v4, 0.0 }
 0x2ef   : > { %v1514_v5 = vpop.f32.mrb[36].mxu1  ;;  %v1571_v1 = vpop.f32.mrb[36].mxu0 }
 0x2f0   : > { %v1577_v6 = vrot.slane %v1514_v5, 3  ;;  %v1579_v7 = vrot.slane %v1571_v1, 3  ;;  %v2716_v8 = vpop.f32.mrb[37].mxu1  ;;  %v2724_v9 = vpop.f32.mrb[37].mxu0 }
 0x2f1   : > { %v1517_v10 = vpop.f32.mrb[38].mxu1  ;;  %v1574_v12 = vpop.f32.mrb[38].mxu0 }
 0x2f2   : > { %v1578_v15 = vsel %vm708_vm4, %v1577_v6, 0.0  ;;  %v1580_v16 = vsel %vm708_vm4, %v1579_v7, 0.0  ;;  %v2717_v17 = vpop.f32.mrb[39].mxu1  ;;  %v2725_v18 = vpop.f32.mrb[39].mxu0 }
 0x2f3   : > { %v1581_v19 = vadd.f32 %v1578_v15, %v1458_v13  ;;  %v1582_v20 = vadd.f32 %v1580_v16, %v1460_v14  ;;  %v2475_v17 = vld [vmem:[%s3416_s8 + $0x1] ss:$0 sm:$0xff] }
 0x2f7   : > { %v1634_v21 = vpop.f32.mrb[40].mxu1  ;;  %v1691_v22 = vpop.f32.mrb[40].mxu0 }
 0x2f8   : > { %v1697_v23 = vrot.slane %v1634_v21, 4  ;;  %v1699_v25 = vrot.slane %v1691_v22, 4  ;;  %v2732_v26 = vpop.f32.mrb[41].mxu1  ;;  %v2740_v27 = vpop.f32.mrb[41].mxu0 }
 0x2f9   : > { %v1637_v28 = vpop.f32.mrb[42].mxu1  ;;  %v1694_v29 = vpop.f32.mrb[42].mxu0 }
 0x2fa   : > { %v1698_v30 = vsel %vm829_vm5, %v1697_v23, 0.0  ;;  %v1700_v31 = vsel %vm829_vm5, %v1699_v25, 0.0  ;;  %v2733_v32 = vpop.f32.mrb[43].mxu1  ;;  %v2741_v34 = vpop.f32.mrb[43].mxu0 }
 0x2fb   : > { %v1701_v35 = vadd.f32 %v1698_v30, %v1581_v19  ;;  %v1702_v36 = vadd.f32 %v1700_v31, %v1582_v20  ;;  %v2473_v30 = vld [vmem:[%s3415_s7 + $0x1] ss:$0 sm:$0xff] }
 0x2ff   : > { %v1754_v24 = vpop.f32.mrb[44].mxu1  ;;  %v1811_v37 = vpop.f32.mrb[44].mxu0 }
 0x300   : > { %v1817_v38 = vrot.slane %v1754_v24, 5  ;;  %v1819_v39 = vrot.slane %v1811_v37, 5  ;;  %v2748_v40 = vpop.f32.mrb[45].mxu1  ;;  %v2756_v41 = vpop.f32.mrb[45].mxu0 }
 0x301   : > { %v1757_v42 = vpop.f32.mrb[46].mxu1  ;;  %v1814_v43 = vpop.f32.mrb[46].mxu0 }
 0x302   : > { %v1818_v44 = vsel %vm950_vm6, %v1817_v38, 0.0  ;;  %v1820_v45 = vsel %vm950_vm6, %v1819_v39, 0.0  ;;  %v2749_v46 = vpop.f32.mrb[47].mxu1  ;;  %v2757_v47 = vpop.f32.mrb[47].mxu0 }
 0x303   : > { %v1821_v48 = vadd.f32 %v1818_v44, %v1701_v35  ;;  %v1822_v49 = vadd.f32 %v1820_v45, %v1702_v36 }
 0x307   : > { %v1874_v50 = vpop.f32.mrb[48].mxu1  ;;  %v1931_v51 = vpop.f32.mrb[48].mxu0 }
 0x308   : > { %v1937_v52 = vrot.slane %v1874_v50, 6  ;;  %v1939_v53 = vrot.slane %v1931_v51, 6  ;;  %v2764_v54 = vpop.f32.mrb[49].mxu1  ;;  %v2772_v55 = vpop.f32.mrb[49].mxu0 }
 0x309   : > { %v1877_v56 = vpop.f32.mrb[50].mxu1  ;;  %v1934_v57 = vpop.f32.mrb[50].mxu0 }
 0x30a   : > { %v1938_v58 = vsel %vm1071_vm7, %v1937_v52, 0.0  ;;  %v1940_v59 = vsel %vm1071_vm7, %v1939_v53, 0.0  ;;  %v2765_v60 = vpop.f32.mrb[51].mxu1  ;;  %v2773_v61 = vpop.f32.mrb[51].mxu0 }
 0x30b   : > { %v1941_v62 = vadd.f32 %v1938_v58, %v1821_v48  ;;  %v1942_v63 = vadd.f32 %v1940_v59, %v1822_v49 }
 0x30f   : > { %v1994_v0 = vpop.f32.mrb[52].mxu1  ;;  %v2051_v2 = vpop.f32.mrb[52].mxu0 }
 0x310   : > { %v2057_v3 = vrot.slane %v1994_v0, 7  ;;  %v2059_v4 = vrot.slane %v2051_v2, 7  ;;  %v2780_v5 = vpop.f32.mrb[53].mxu1  ;;  %v2788_v1 = vpop.f32.mrb[53].mxu0 }
 0x311   : > { %v1997_v6 = vpop.f32.mrb[54].mxu1  ;;  %v2054_v7 = vpop.f32.mrb[54].mxu0 }
 0x312   : > { %v2058_v8 = vsel %vm1192_vm8, %v2057_v3, 0.0  ;;  %v2060_v9 = vsel %vm1192_vm8, %v2059_v4, 0.0  ;;  %v2781_v10 = vpop.f32.mrb[55].mxu1  ;;  %v2789_v12 = vpop.f32.mrb[55].mxu0 }
 0x313   : > { %v2061_v13 = vadd.f32 %v2058_v8, %v1941_v62  ;;  %v2062_v14 = vadd.f32 %v2060_v9, %v1942_v63 }
 0x317   : > { %v2114_v15 = vpop.f32.mrb[56].mxu1  ;;  %v2171_v16 = vpop.f32.mrb[56].mxu0 }
 0x318   : > { %v2177_v18 = vadd.f32 %v2114_v15, %v2061_v13  ;;  %v2178_v19 = vadd.f32 %v2171_v16, %v2062_v14  ;;  %v2796_v20 = vpop.f32.mrb[57].mxu1  ;;  %v2804_v21 = vpop.f32.mrb[57].mxu0 }
 0x319   : > { %v2117_v22 = vpop.f32.mrb[58].mxu1  ;;  %v2174_v23 = vpop.f32.mrb[58].mxu0 }
 0x31a   : > { %v2196_v25 = vadd.f32 %v2475_v17, %v2178_v19  ;;  %v2797_v11 = vpop.f32.mrb[59].mxu1  ;;  %v2805_v26 = vpop.f32.mrb[59].mxu0  ;;  %v2187_v31 = vadd.f32 %v2473_v30, %v2177_v18 }
 0x31c   : > { %v2476_v27 = vmul.f32 -1.442695, %v2196_v25 }
 0x31e   : > { %2879 = vpow2.f32 %v2476_v27 }
 0x328   : > { %v2880_v28 = vpop.eup %2879 }
 0x329   : > { %v2200_v29 = vadd.f32 1.0, %v2880_v28 }
 0x32b   : > { %2881 = vrcp.f32 %v2200_v29 }
 0x335   : > { %v2882_v32 = vpop.eup %2881 }
 0x336   : > { %v2203_v34 = vmul.f32 %v2882_v32, %v2187_v31 }
 0x338   : > { %v2204_v35 = vadd.f32 %v2203_v34, %v3217_v33 }
 0x33a   : > { %2205 = vst.msk [vmem:[%s341_s16] sm:$0xff] %vm360_vm2, %v2204_v35 }
 0x33b PF: > { %s19_s30 = sadd.s32 1, %s2889_s30  }
 0x33c   : > { %p16_p4 = scmp.ge.s32.totalorder %s19_s30, 4  }
 0x33e   :  { %18 = sbr.rel (!%p16_p4) target bundleno = 1 (0x1), region = 117 }

</bundles_post_ra>
